<compile_context>
chip_gen: v7x
topology: tpu7x:2x2x1
jax: 0.10.0
libtpu: 0.0.40
codegen_flags: <defaults>
</compile_context>

<pallas_src>
import jax
import jax.numpy as jnp
import numpy as np
from jax.experimental import pallas as pl
from jax.experimental.pallas import tpu as pltpu

EPS = 1e-3


def _fused_kernel(x_ref, gate_ref, w_ref, gamma_ref, beta_ref, o_ref):
    # x_ref:     [N, Cin, HW]     bf16   (free reshape of NCHW, pre-cast)
    # gate_ref:  [N, 1,   Cin]    f32    (lane-dense channel gate)
    # w_ref:     [tCout, Cin]     bf16   (1x1 conv weight block)
    # gamma_ref: [tCout, 1]       f32
    # beta_ref:  [tCout, 1]       f32
    # o_ref:     [N, tCout, HW]   f32    (also used as staging for z)
    N, _, HW = x_ref.shape
    t_cout = w_ref.shape[0]

    w_f32 = w_ref[...].astype(jnp.float32)            # [tCout, Cin]

    zsum = jnp.zeros((t_cout, 1), jnp.float32)
    zsqsum = jnp.zeros((t_cout, 1), jnp.float32)

    # N is tiny (1-2); static unrolled loop keeps everything on clean 2D tiles.
    for n in range(N):
        # Sigmoid on a lane-dense [1, Cin] row (EUP), gate folded into weight.
        g = jax.nn.sigmoid(gate_ref[n])                # [1, Cin] f32
        # f32 multiply (sublane broadcast over Cout), single bf16 rounding.
        wg = (w_f32 * g).astype(jnp.bfloat16)          # [tCout, Cin] bf16
        # 1x1 conv == MXU matmul; bf16 operands, f32 accumulation.
        z = jnp.dot(wg, x_ref[n],
                    preferred_element_type=jnp.float32)  # [tCout, HW] f32
        # Stage z in the output VMEM block (no long vreg live ranges).
        o_ref[n] = z
        # One-pass batch statistics (sum and sum of squares together).
        zsum = zsum + jnp.sum(z, axis=1, keepdims=True)
        zsqsum = zsqsum + jnp.sum(z * z, axis=1, keepdims=True)

    inv_cnt = 1.0 / float(N * HW)
    mean = zsum * inv_cnt
    var = jnp.maximum(zsqsum * inv_cnt - mean * mean, 0.0)
    inv = jax.lax.rsqrt(var + EPS)

    # Fold gamma/beta into a single per-channel scale + shift.
    scale = gamma_ref[...] * inv                       # [tCout, 1]
    shift = beta_ref[...] - mean * scale               # [tCout, 1]

    for n in range(N):
        o_ref[n] = o_ref[n] * scale + shift


def prepare_conv_weight(w_oi11):
    """Call ONCE at parameter-init time: [Cout, Cin, 1, 1] f32 -> [Cout, Cin] bf16."""
    cout, cin = w_oi11.shape[:2]
    return w_oi11.reshape(cout, cin).astype(jnp.bfloat16)


def _default_cout_blocks():
    # v7x has 2 TensorCores per chip -> split the (per-channel, hence exact)
    # BN work over Cout halves.  Keep a single monolithic block on v5e/v6e.
    try:
        kind = jax.devices()[0].device_kind.lower()
    except Exception:
        return 1
    return 2 if ("v7" in kind or "7x" in kind) else 1


def fused_sigmoid_mul_conv_bn(x_nchw, gate_nc11, w_bf16, gamma, beta,
                              *, num_cout_blocks=None):
    """x_nchw: [N, Cin, H, W], gate_nc11: [N, Cin, 1, 1],
       w_bf16: [Cout, Cin] bf16 (from prepare_conv_weight),
       gamma/beta: [Cout]  ->  [N, Cout, H, W] f32"""
    N, Cin, H, W = x_nchw.shape
    Cout = w_bf16.shape[0]
    HW = H * W

    if num_cout_blocks is None:
        num_cout_blocks = _default_cout_blocks()
    g_req = max(1, int(num_cout_blocks))

    # Cout tile: multiple of 8 (sublane alignment); last block may be ragged
    # (per-channel BN makes the padded rows harmless, writeback is clipped).
    t_cout = min(((pl.cdiv(Cout, g_req) + 7) // 8) * 8, ((Cout + 7) // 8) * 8)
    g_eff = pl.cdiv(Cout, t_cout)

    # Layout plumbing: pure reshapes (free), no transposes.
    x = x_nchw.reshape(N, Cin, HW).astype(jnp.bfloat16)
    gate = gate_nc11.reshape(N, 1, Cin).astype(jnp.float32)
    gamma2 = gamma.reshape(Cout, 1).astype(jnp.float32)
    beta2 = beta.reshape(Cout, 1).astype(jnp.float32)

    out = pl.pallas_call(
        _fused_kernel,
        out_shape=jax.ShapeDtypeStruct((N, Cout, HW), jnp.float32),
        grid=(g_eff,),
        in_specs=[
            pl.BlockSpec((N, Cin, HW), lambda j: (0, 0, 0)),   # x (resident)
            pl.BlockSpec((N, 1, Cin), lambda j: (0, 0, 0)),    # gate
            pl.BlockSpec((t_cout, Cin), lambda j: (j, 0)),     # weight block
            pl.BlockSpec((t_cout, 1), lambda j: (j, 0)),       # gamma block
            pl.BlockSpec((t_cout, 1), lambda j: (j, 0)),       # beta block
        ],
        out_specs=pl.BlockSpec((N, t_cout, HW), lambda j: (0, j, 0)),
        compiler_params=pltpu.CompilerParams(
            dimension_semantics=("parallel",),
            vmem_limit_bytes=16 * 1024 * 1024),
    )(x, gate, w_bf16, gamma2, beta2)

    return out.reshape(N, Cout, H, W)   # free reshape back to NCHW


def _reference(x_nchw, gate_nc11, w_oi11, gamma, beta):
    """Pure-JAX f32 reference matching PyTorch training-mode forward."""
    y = jax.nn.sigmoid(gate_nc11) * x_nchw
    z = jax.lax.conv_general_dilated(
        y, w_oi11, window_strides=(1, 1), padding="VALID",
        dimension_numbers=("NCHW", "OIHW", "NCHW"))
    mean = jnp.mean(z, axis=(0, 2, 3), keepdims=True)
    var = jnp.mean((z - mean) ** 2, axis=(0, 2, 3), keepdims=True)
    zn = (z - mean) / jnp.sqrt(var + EPS)
    return zn * gamma.reshape(1, -1, 1, 1) + beta.reshape(1, -1, 1, 1)


if __name__ == "__main__":
    # Small shapes, structure-identical to the module (real: N=1, Cin=2064,
    # Cout=344, H=W=7).  H=W=7 kept to exercise the ragged-lane HW case.
    N, Cin, Cout, H, W = 2, 256, 128, 7, 7

    key = jax.random.PRNGKey(0)
    kx, kg, kw = jax.random.split(key, 3)
    x580 = jax.random.normal(kx, (N, Cin, H, W), dtype=jnp.float32)
    x584 = jax.random.normal(kg, (N, Cin, 1, 1), dtype=jnp.float32)

    # Conv weight (kaiming-style scale); BN affine params gamma=1, beta=0.
    w = jax.random.normal(kw, (Cout, Cin, 1, 1), dtype=jnp.float32) * (1.0 / np.sqrt(Cin))
    gamma = jnp.ones((Cout,), dtype=jnp.float32)
    beta = jnp.zeros((Cout,), dtype=jnp.float32)

    # One-time (parameter-init) bf16 cast of the conv weight.
    w_bf16 = jax.block_until_ready(prepare_conv_weight(w))

    ref = jax.block_until_ready(_reference(x580, x584, w, gamma, beta))

    # Exercise both the monolithic (v5e/v6e default) and the 2-way Cout-split
    # (v7x dual-TensorCore) paths, then the device-default selection.
    for blocks in (1, 2, None):
        out = fused_sigmoid_mul_conv_bn(x580, x584, w_bf16, gamma, beta,
                                        num_cout_blocks=blocks)
        out = jax.block_until_ready(out)
        # Tolerance accounts for bf16 MXU operands (x, w, w*gate) with f32
        # accumulation and f32 BN statistics; post-BN outputs are ~N(0,1).
        np.testing.assert_allclose(np.asarray(out), np.asarray(ref),
                                   atol=3e-2, rtol=3e-2)

    print("KERNEL_OK")
</pallas_src>

<mosaic_0001>
module attributes {stable_mosaic.version = 11 : i64} {
  func.func @_fused_kernel(%arg0: i32, %arg1: memref<2x256x49xbf16, #tpu.memory_space<vmem>>, %arg2: memref<2x1x256xf32, #tpu.memory_space<vmem>>, %arg3: memref<128x256xbf16, #tpu.memory_space<vmem>>, %arg4: memref<128x1xf32, #tpu.memory_space<vmem>>, %arg5: memref<128x1xf32, #tpu.memory_space<vmem>>, %arg6: memref<2x128x49xf32, #tpu.memory_space<vmem>>) attributes {dimension_semantics = [#tpu.dimension_semantics<parallel>], iteration_bounds = array<i64: 1>, scalar_prefetch = 0 : i64, scratch_operands = 0 : i64, tpu.core_type = #tpu.core_type<tc>, window_params = [{pipeline_mode = #tpu.pipeline_mode<synchronous>, transform_indices = @transform_0, window_bounds = array<i64: 2, 256, 49>}, {pipeline_mode = #tpu.pipeline_mode<synchronous>, transform_indices = @transform_1, window_bounds = array<i64: 2, 1, 256>}, {transform_indices = @transform_2, window_bounds = array<i64: 128, 256>}, {transform_indices = @transform_3, window_bounds = array<i64: 128, 1>}, {transform_indices = @transform_4, window_bounds = array<i64: 128, 1>}, {transform_indices = @transform_5, window_bounds = array<i64: 2, 128, 49>}]} {
    %c0 = arith.constant 0 : index
    %c0_0 = arith.constant 0 : index
    %0 = vector.load %arg3[%c0, %c0_0] : memref<128x256xbf16, #tpu.memory_space<vmem>>, vector<128x256xbf16>
    %1 = arith.extf %0 : vector<128x256xbf16> to vector<128x256xf32>
    %cst = arith.constant 0.000000e+00 : f32
    %2 = vector.broadcast %cst : f32 to vector<128x1xf32>
    %cst_1 = arith.constant 0.000000e+00 : f32
    %3 = vector.broadcast %cst_1 : f32 to vector<128x1xf32>
    %c0_2 = arith.constant 0 : index
    %c0_3 = arith.constant 0 : index
    %c0_4 = arith.constant 0 : index
    %4 = vector.load %arg2[%c0_2, %c0_3, %c0_4] : memref<2x1x256xf32, #tpu.memory_space<vmem>>, vector<1x1x256xf32>
    %5 = vector.shape_cast %4 : vector<1x1x256xf32> to vector<1x256xf32>
    %6 = arith.negf %5 : vector<1x256xf32>
    %7 = math.exp %6 : vector<1x256xf32>
    %cst_5 = arith.constant 1.000000e+00 : f32
    %8 = vector.broadcast %cst_5 : f32 to vector<1x256xf32>
    %9 = arith.addf %8, %7 : vector<1x256xf32>
    %10 = arith.divf %8, %9 : vector<1x256xf32>
    %11 = vector.broadcast %10 : vector<1x256xf32> to vector<128x256xf32>
    %12 = arith.mulf %1, %11 : vector<128x256xf32>
    %13 = arith.truncf %12 : vector<128x256xf32> to vector<128x256xbf16>
    %c0_6 = arith.constant 0 : index
    %c0_7 = arith.constant 0 : index
    %c0_8 = arith.constant 0 : index
    %14 = vector.load %arg1[%c0_6, %c0_7, %c0_8] : memref<2x256x49xbf16, #tpu.memory_space<vmem>>, vector<1x256x49xbf16>
    %15 = vector.shape_cast %14 : vector<1x256x49xbf16> to vector<256x49xbf16>
    %cst_9 = arith.constant dense<0.000000e+00> : vector<128x49xf32>
    %16 = tpu.matmul %13, %15, %cst_9 {dimension_numbers = #tpu.dot_dimension_numbers<[1], [0], [0], [1], [0, 0, 1, 1], [], []>} : vector<128x256xbf16>, vector<256x49xbf16>, vector<128x49xf32> -> vector<128x49xf32>
    %c0_10 = arith.constant 0 : index
    %c0_11 = arith.constant 0 : index
    %c0_12 = arith.constant 0 : index
    %17 = vector.load %arg6[%c0_10, %c0_11, %c0_12] : memref<2x128x49xf32, #tpu.memory_space<vmem>>, vector<1x128x49xf32>
    %18 = vector.shape_cast %17 : vector<1x128x49xf32> to vector<128x49xf32>
    %19 = vector.shape_cast %16 : vector<128x49xf32> to vector<1x128x49xf32>
    tpu.vector_store %arg6[%c0_10, %c0_11, %c0_12], %19 {strides = array<i32>} : memref<2x128x49xf32, #tpu.memory_space<vmem>>, vector<1x128x49xf32>,
    %cst_13 = arith.constant dense<0.000000e+00> : vector<128xf32>
    %20 = vector.multi_reduction <add>, %16, %cst_13 [1] : vector<128x49xf32> to vector<128xf32>
    %21 = vector.shape_cast %20 : vector<128xf32> to vector<128x1xf32>
    %22 = arith.addf %2, %21 : vector<128x1xf32>
    %23 = arith.mulf %16, %16 : vector<128x49xf32>
    %cst_14 = arith.constant dense<0.000000e+00> : vector<128xf32>
    %24 = vector.multi_reduction <add>, %23, %cst_14 [1] : vector<128x49xf32> to vector<128xf32>
    %25 = vector.shape_cast %24 : vector<128xf32> to vector<128x1xf32>
    %26 = arith.addf %3, %25 : vector<128x1xf32>
    %c1 = arith.constant 1 : index
    %c0_15 = arith.constant 0 : index
    %c0_16 = arith.constant 0 : index
    %27 = vector.load %arg2[%c1, %c0_15, %c0_16] : memref<2x1x256xf32, #tpu.memory_space<vmem>>, vector<1x1x256xf32>
    %28 = vector.shape_cast %27 : vector<1x1x256xf32> to vector<1x256xf32>
    %29 = arith.negf %28 : vector<1x256xf32>
    %30 = math.exp %29 : vector<1x256xf32>
    %cst_17 = arith.constant 1.000000e+00 : f32
    %31 = vector.broadcast %cst_17 : f32 to vector<1x256xf32>
    %32 = arith.addf %31, %30 : vector<1x256xf32>
    %33 = arith.divf %31, %32 : vector<1x256xf32>
    %34 = vector.broadcast %33 : vector<1x256xf32> to vector<128x256xf32>
    %35 = arith.mulf %1, %34 : vector<128x256xf32>
    %36 = arith.truncf %35 : vector<128x256xf32> to vector<128x256xbf16>
    %c1_18 = arith.constant 1 : index
    %c0_19 = arith.constant 0 : index
    %c0_20 = arith.constant 0 : index
    %37 = vector.load %arg1[%c1_18, %c0_19, %c0_20] : memref<2x256x49xbf16, #tpu.memory_space<vmem>>, vector<1x256x49xbf16>
    %38 = vector.shape_cast %37 : vector<1x256x49xbf16> to vector<256x49xbf16>
    %cst_21 = arith.constant dense<0.000000e+00> : vector<128x49xf32>
    %39 = tpu.matmul %36, %38, %cst_21 {dimension_numbers = #tpu.dot_dimension_numbers<[1], [0], [0], [1], [0, 0, 1, 1], [], []>} : vector<128x256xbf16>, vector<256x49xbf16>, vector<128x49xf32> -> vector<128x49xf32>
    %c1_22 = arith.constant 1 : index
    %c0_23 = arith.constant 0 : index
    %c0_24 = arith.constant 0 : index
    %40 = vector.load %arg6[%c1_22, %c0_23, %c0_24] : memref<2x128x49xf32, #tpu.memory_space<vmem>>, vector<1x128x49xf32>
    %41 = vector.shape_cast %40 : vector<1x128x49xf32> to vector<128x49xf32>
    %42 = vector.shape_cast %39 : vector<128x49xf32> to vector<1x128x49xf32>
    tpu.vector_store %arg6[%c1_22, %c0_23, %c0_24], %42 {strides = array<i32>} : memref<2x128x49xf32, #tpu.memory_space<vmem>>, vector<1x128x49xf32>,
    %cst_25 = arith.constant dense<0.000000e+00> : vector<128xf32>
    %43 = vector.multi_reduction <add>, %39, %cst_25 [1] : vector<128x49xf32> to vector<128xf32>
    %44 = vector.shape_cast %43 : vector<128xf32> to vector<128x1xf32>
    %45 = arith.addf %22, %44 : vector<128x1xf32>
    %46 = arith.mulf %39, %39 : vector<128x49xf32>
    %cst_26 = arith.constant dense<0.000000e+00> : vector<128xf32>
    %47 = vector.multi_reduction <add>, %46, %cst_26 [1] : vector<128x49xf32> to vector<128xf32>
    %48 = vector.shape_cast %47 : vector<128xf32> to vector<128x1xf32>
    %49 = arith.addf %26, %48 : vector<128x1xf32>
    %cst_27 = arith.constant 0.0102040814 : f32
    %50 = vector.broadcast %cst_27 : f32 to vector<128x1xf32>
    %51 = arith.mulf %45, %50 : vector<128x1xf32>
    %cst_28 = arith.constant 0.0102040814 : f32
    %52 = vector.broadcast %cst_28 : f32 to vector<128x1xf32>
    %53 = arith.mulf %49, %52 : vector<128x1xf32>
    %54 = arith.mulf %51, %51 : vector<128x1xf32>
    %55 = arith.subf %53, %54 : vector<128x1xf32>
    %cst_29 = arith.constant 0.000000e+00 : f32
    %56 = vector.broadcast %cst_29 : f32 to vector<128x1xf32>
    %57 = arith.maximumf %55, %56 : vector<128x1xf32>
    %cst_30 = arith.constant 1.000000e-03 : f32
    %58 = vector.broadcast %cst_30 : f32 to vector<128x1xf32>
    %59 = arith.addf %57, %58 : vector<128x1xf32>
    %60 = math.rsqrt %59 : vector<128x1xf32>
    %c0_31 = arith.constant 0 : index
    %c0_32 = arith.constant 0 : index
    %61 = vector.load %arg4[%c0_31, %c0_32] : memref<128x1xf32, #tpu.memory_space<vmem>>, vector<128x1xf32>
    %62 = arith.mulf %61, %60 : vector<128x1xf32>
    %c0_33 = arith.constant 0 : index
    %c0_34 = arith.constant 0 : index
    %63 = vector.load %arg5[%c0_33, %c0_34] : memref<128x1xf32, #tpu.memory_space<vmem>>, vector<128x1xf32>
    %64 = arith.mulf %51, %62 : vector<128x1xf32>
    %65 = arith.subf %63, %64 : vector<128x1xf32>
    %c0_35 = arith.constant 0 : index
    %c0_36 = arith.constant 0 : index
    %c0_37 = arith.constant 0 : index
    %66 = vector.load %arg6[%c0_35, %c0_36, %c0_37] : memref<2x128x49xf32, #tpu.memory_space<vmem>>, vector<1x128x49xf32>
    %67 = vector.shape_cast %66 : vector<1x128x49xf32> to vector<128x49xf32>
    %68 = vector.broadcast %62 : vector<128x1xf32> to vector<128x49xf32>
    %69 = arith.mulf %67, %68 : vector<128x49xf32>
    %70 = vector.broadcast %65 : vector<128x1xf32> to vector<128x49xf32>
    %71 = arith.addf %69, %70 : vector<128x49xf32>
    %c0_38 = arith.constant 0 : index
    %c0_39 = arith.constant 0 : index
    %c0_40 = arith.constant 0 : index
    %72 = vector.load %arg6[%c0_38, %c0_39, %c0_40] : memref<2x128x49xf32, #tpu.memory_space<vmem>>, vector<1x128x49xf32>
    %73 = vector.shape_cast %72 : vector<1x128x49xf32> to vector<128x49xf32>
    %74 = vector.shape_cast %71 : vector<128x49xf32> to vector<1x128x49xf32>
    tpu.vector_store %arg6[%c0_38, %c0_39, %c0_40], %74 {strides = array<i32>} : memref<2x128x49xf32, #tpu.memory_space<vmem>>, vector<1x128x49xf32>,
    %c1_41 = arith.constant 1 : index
    %c0_42 = arith.constant 0 : index
    %c0_43 = arith.constant 0 : index
    %75 = vector.load %arg6[%c1_41, %c0_42, %c0_43] : memref<2x128x49xf32, #tpu.memory_space<vmem>>, vector<1x128x49xf32>
    %76 = vector.shape_cast %75 : vector<1x128x49xf32> to vector<128x49xf32>
    %77 = vector.broadcast %62 : vector<128x1xf32> to vector<128x49xf32>
    %78 = arith.mulf %76, %77 : vector<128x49xf32>
    %79 = vector.broadcast %65 : vector<128x1xf32> to vector<128x49xf32>
    %80 = arith.addf %78, %79 : vector<128x49xf32>
    %c1_44 = arith.constant 1 : index
    %c0_45 = arith.constant 0 : index
    %c0_46 = arith.constant 0 : index
    %81 = vector.load %arg6[%c1_44, %c0_45, %c0_46] : memref<2x128x49xf32, #tpu.memory_space<vmem>>, vector<1x128x49xf32>
    %82 = vector.shape_cast %81 : vector<1x128x49xf32> to vector<128x49xf32>
    %83 = vector.shape_cast %80 : vector<128x49xf32> to vector<1x128x49xf32>
    tpu.vector_store %arg6[%c1_44, %c0_45, %c0_46], %83 {strides = array<i32>} : memref<2x128x49xf32, #tpu.memory_space<vmem>>, vector<1x128x49xf32>,
    return
  }
  func.func @transform_0(%arg0: i32) -> (i32, i32, i32) {
    %c0_i32 = arith.constant 0 : i32
    %c0_i32_0 = arith.constant 0 : i32
    %c0_i32_1 = arith.constant 0 : i32
    %c0_i32_2 = arith.constant 0 : i32
    return %c0_i32, %c0_i32_0, %c0_i32_1 : i32, i32, i32
  }
  func.func @transform_1(%arg0: i32) -> (i32, i32, i32) {
    %c0_i32 = arith.constant 0 : i32
    %c0_i32_0 = arith.constant 0 : i32
    %c0_i32_1 = arith.constant 0 : i32
    %c0_i32_2 = arith.constant 0 : i32
    return %c0_i32, %c0_i32_0, %c0_i32_1 : i32, i32, i32
  }
  func.func @transform_2(%arg0: i32) -> (i32, i32) {
    %c0_i32 = arith.constant 0 : i32
    %c0_i32_0 = arith.constant 0 : i32
    return %arg0, %c0_i32 : i32, i32
  }
  func.func @transform_3(%arg0: i32) -> (i32, i32) {
    %c0_i32 = arith.constant 0 : i32
    %c0_i32_0 = arith.constant 0 : i32
    return %arg0, %c0_i32 : i32, i32
  }
  func.func @transform_4(%arg0: i32) -> (i32, i32) {
    %c0_i32 = arith.constant 0 : i32
    %c0_i32_0 = arith.constant 0 : i32
    return %arg0, %c0_i32 : i32, i32
  }
  func.func @transform_5(%arg0: i32) -> (i32, i32, i32) {
    %c0_i32 = arith.constant 0 : i32
    %c0_i32_0 = arith.constant 0 : i32
    %c0_i32_1 = arith.constant 0 : i32
    return %c0_i32, %arg0, %c0_i32_0 : i32, i32, i32
  }
}

</mosaic_0001>

<bundles_post_ra>
// kernel: tpu_custom_call.1
= control target key start
LH: loop header
LB: loop body
LE: loop exit
PB: predicated region body
PF: predicated region fallthrough
CT: control target
= control target key end

     0   :  { %v77_v39 = vlaneseq  ;;  %vm360_vm0 = vcmask 400384   ;;  %s2746_s0 = inlined_call_operand.vmem [shape: bf16[2,256,49], index: 0, kind: input, shape index: {}]   ;;  %s2747_s1 = inlined_call_operand.vmem [shape: f32[2,1,256], index: 1, kind: input, shape index: {}]   ;;  %s2748_s2 = inlined_call_operand.vmem [shape: bf16[128,256], index: 2, kind: input, shape index: {}]   ;;  %s2749_s5 = inlined_call_operand.vmem [shape: f32[2,128,49], index: 5, kind: output, shape index: {}]   ;;  %s2750_s3 = inlined_call_operand.vmem [shape: f32[128,1], index: 3, kind: input, shape index: {}]   ;;  %s2751_s4 = inlined_call_operand.vmem [shape: f32[128,1], index: 4, kind: input, shape index: {}]  }
   0x1   :  { %v1705_v0 = vld [vmem:[%s2746_s0 + $0x40] sm:$0xff]   ;;  %v1709_v4 = vld [vmem:[%s2746_s0 + $0x48] sm:$0xff]   ;;  %v1713_v8 = vld [vmem:[%s2746_s0 + $0x50] sm:$0xff]  }
   0x2   :  { %v1706_v1 = vld [vmem:[%s2746_s0 + $0xc0] sm:$0xff]   ;;  %1574 = vmatprep.subr.bf16.mxu0 %v1705_v0  ;;  %v1710_v5 = vld [vmem:[%s2746_s0 + $0xc8] sm:$0xff]   ;;  %v1714_v9 = vld [vmem:[%s2746_s0 + $0xd0] sm:$0xff]   ;;  %v78_v41 = vshrl.u32 %v77_v39, 7 }
   0x3   :  { %v1707_v2 = vld [vmem:[%s2746_s0] sm:$0xff]   ;;  %1638 = vmatprep.subr.bf16.mxu1 %v1706_v1  ;;  %v1711_v6 = vld [vmem:[%s2746_s0 + $0x8] sm:$0xff]   ;;  %v1715_v10 = vld [vmem:[%s2746_s0 + $0x10] sm:$0xff]  }
   0x4   :  { %v1708_v3 = vld [vmem:[%s2746_s0 + $0x80] sm:$0xff]   ;;  %1575 = vmatpush3.bf16.msra.mxu0 %v1707_v2  ;;  %v1712_v7 = vld [vmem:[%s2746_s0 + $0x88] sm:$0xff]   ;;  %v1716_v11 = vld [vmem:[%s2746_s0 + $0x90] sm:$0xff]   ;;  %v83_v44 = vsub.s32 1, %v78_v41  ;;  %v79_v45 = vsub.s32 0, %v78_v41 }
   0x5   :  { %1639 = vmatpush3.bf16.msra.mxu1 %v1708_v3  ;;  %1576 = vmatprep.subr.bf16.mxu0 %v1709_v4  ;;  %v1717_v12 = vld [vmem:[%s2746_s0 + $0x58] sm:$0xff]   ;;  %v1721_v16 = vld [vmem:[%s2746_s0 + $0x60] sm:$0xff]   ;;  %v1725_v20 = vld [vmem:[%s2746_s0 + $0x68] sm:$0xff]  }
   0x6   :  { %1640 = vmatprep.subr.bf16.mxu1 %v1710_v5  ;;  %v1718_v13 = vld [vmem:[%s2746_s0 + $0xd8] sm:$0xff]   ;;  %v1722_v17 = vld [vmem:[%s2746_s0 + $0xe0] sm:$0xff]   ;;  %v1726_v21 = vld [vmem:[%s2746_s0 + $0xe8] sm:$0xff]  }
   0x7   :  { %v1719_v14 = vld [vmem:[%s2746_s0 + $0x18] sm:$0xff]   ;;  %v1723_v18 = vld [vmem:[%s2746_s0 + $0x20] sm:$0xff]   ;;  %v1727_v22 = vld [vmem:[%s2746_s0 + $0x28] sm:$0xff]  }
   0x8   :  { %1577 = vmatpush3.bf16.msra.mxu0 %v1711_v6  ;;  %v1720_v15 = vld [vmem:[%s2746_s0 + $0x98] sm:$0xff]   ;;  %v1724_v19 = vld [vmem:[%s2746_s0 + $0xa0] sm:$0xff]   ;;  %v1728_v23 = vld [vmem:[%s2746_s0 + $0xa8] sm:$0xff]  }
   0x9   :  { %1641 = vmatpush3.bf16.msra.mxu1 %v1712_v7  ;;  %1578 = vmatprep.subr.bf16.mxu0 %v1713_v8  ;;  %v1729_v24 = vld [vmem:[%s2746_s0 + $0x70] sm:$0xff]   ;;  %v1733_v28 = vld [vmem:[%s2746_s0 + $0x78] sm:$0xff]   ;;  %v69_v32 = vld [vmem:[%s2747_s1] sm:$0x3] }
   0xa   :  { %1642 = vmatprep.subr.bf16.mxu1 %v1714_v9  ;;  %v1730_v25 = vld [vmem:[%s2746_s0 + $0xf0] sm:$0xff]   ;;  %v1734_v29 = vld [vmem:[%s2746_s0 + $0xf8] sm:$0xff]   ;;  %v1476_v33 = vld [vmem:[%s2747_s1 + $0x2] sm:$0x3]  ;;  %v1459_v34 = vmul.f32 -1.442695, %v69_v32 }
   0xb   :  { %v1731_v26 = vld [vmem:[%s2746_s0 + $0x30] sm:$0xff]   ;;  %v1735_v30 = vld [vmem:[%s2746_s0 + $0x38] sm:$0xff]   ;;  %v1477_v35 = vmul.f32 -1.442695, %v1476_v33  ;;  %v21_v42 = vld [vmem:[%s2748_s2] sm:$0xff] }
   0xc   :  { %1579 = vmatpush3.bf16.msra.mxu0 %v1715_v10  ;;  %v1732_v27 = vld [vmem:[%s2746_s0 + $0xb0] sm:$0xff]   ;;  %v1736_v31 = vld [vmem:[%s2746_s0 + $0xb8] sm:$0xff]   ;;  %1737 = vpow2.f32 %v1459_v34  ;;  %v22_v43 = vld [vmem:[%s2748_s2 + $0x8] sm:$0xff]  ;;  %v37_v48 = vunpack.c.l.bf16 %v21_v42  ;;  %v38_v49 = vunpack.c.h.bf16 %v21_v42 }
   0xd   :  { %1643 = vmatpush3.bf16.msra.mxu1 %v1716_v11  ;;  %1580 = vmatprep.subr.bf16.mxu0 %v1717_v12  ;;  %1739 = vpow2.f32 %v1477_v35  ;;  %v23_v46 = vld [vmem:[%s2748_s2 + $0x10] sm:$0xff]  ;;  %v24_v47 = vld [vmem:[%s2748_s2 + $0x18] sm:$0xff]  ;;  %v39_v50 = vunpack.c.l.bf16 %v22_v43  ;;  %v40_v51 = vunpack.c.h.bf16 %v22_v43  ;;  %v25_v52 = vld [vmem:[%s2748_s2 + $0x20] sm:$0xff] }
   0xe   :  { %1644 = vmatprep.subr.bf16.mxu1 %v1718_v13  ;;  %v26_v53 = vld [vmem:[%s2748_s2 + $0x28] sm:$0xff]  ;;  %v42_v55 = vunpack.c.h.bf16 %v23_v46  ;;  %v44_v56 = vunpack.c.h.bf16 %v24_v47  ;;  %v41_v60 = vunpack.c.l.bf16 %v23_v46  ;;  %v43_v61 = vunpack.c.l.bf16 %v24_v47  ;;  %v29_v46 = vld [vmem:[%s2748_s2 + $0x40] sm:$0xff] }
   0xf   :  { %v46_v0 = vunpack.c.h.bf16 %v25_v52  ;;  %v48_v1 = vunpack.c.h.bf16 %v26_v53  ;;  %v47_v32 = vunpack.c.l.bf16 %v26_v53  ;;  %v30_v47 = vld [vmem:[%s2748_s2 + $0x48] sm:$0xff]  ;;  %v54_v53 = vunpack.c.h.bf16 %v29_v46 }
  0x10   :  { %1581 = vmatpush3.bf16.msra.mxu0 %v1719_v14 }
  0x11   :  { %1645 = vmatpush3.bf16.msra.mxu1 %v1720_v15  ;;  %1582 = vmatprep.subr.bf16.mxu0 %v1721_v16 }
  0x12   :  { %1646 = vmatprep.subr.bf16.mxu1 %v1722_v17 }
  0x14   :  { %1583 = vmatpush3.bf16.msra.mxu0 %v1723_v18 }
  0x15   :  { %1647 = vmatpush3.bf16.msra.mxu1 %v1724_v19  ;;  %1584 = vmatprep.subr.bf16.mxu0 %v1725_v20 }
  0x16   :  { %1648 = vmatprep.subr.bf16.mxu1 %v1726_v21  ;;  %v1738_v36 = vpop.eup %1737 }
  0x17   :  { %v1740_v37 = vpop.eup %1739  ;;  %v73_v38 = vadd.f32 1.0, %v1738_v36 }
  0x18   :  { %1585 = vmatpush3.bf16.msra.mxu0 %v1727_v22  ;;  %v526_v40 = vadd.f32 1.0, %v1740_v37 }
  0x19   :  { %1649 = vmatpush3.bf16.msra.mxu1 %v1728_v23  ;;  %1586 = vmatprep.subr.bf16.mxu0 %v1729_v24  ;;  %1741 = vrcp.f32 %v73_v38 }
  0x1a   :  { %1650 = vmatprep.subr.bf16.mxu1 %v1730_v25  ;;  %1743 = vrcp.f32 %v526_v40 }
  0x1c   :  { %1587 = vmatpush3.bf16.msra.mxu0 %v1731_v26 }
  0x1d   :  { %1651 = vmatpush3.bf16.msra.mxu1 %v1732_v27  ;;  %1588 = vmatprep.subr.bf16.mxu0 %v1733_v28  ;;  %v27_v28 = vld [vmem:[%s2748_s2 + $0x30] sm:$0xff] }
  0x1e   :  { %1652 = vmatprep.subr.bf16.mxu1 %v1734_v29  ;;  %v28_v29 = vld [vmem:[%s2748_s2 + $0x38] sm:$0xff]  ;;  %v50_v35 = vunpack.c.h.bf16 %v27_v28 }
  0x1f   :  { %v52_v36 = vunpack.c.h.bf16 %v28_v29 }
  0x20   :  { %1589 = vmatpush3.bf16.msra.mxu0 %v1735_v30 }
  0x21   :  { %1653 = vmatpush3.bf16.msra.mxu1 %v1736_v31  ;;  %v45_v31 = vunpack.c.l.bf16 %v25_v52 }
  0x23   :  { %v1742_v54 = vpop.eup %1741 }
  0x24   :  { %v1744_v57 = vpop.eup %1743  ;;  %v1928_v58 = vrot.slane %v1742_v54, %v83_v44  ;;  %v1930_v59 = vrot.slane %v1742_v54, %v79_v45  ;;  %v56_v54 = vunpack.c.h.bf16 %v30_v47 }
  0x25   :  { %v1932_v62 = vrot.slane %v1744_v57, %v83_v44  ;;  %v1934_v63 = vrot.slane %v1744_v57, %v79_v45 }
  0x26   :  { %v88_v2 = vmul.f32 %v1928_v58, %v38_v49  ;;  %v90_v3 = vmul.f32 %v1928_v58, %v40_v51  ;;  %v87_v4 = vmul.f32 %v1930_v59, %v37_v48  ;;  %v89_v5 = vmul.f32 %v1930_v59, %v39_v50 }
  0x27   :  { %v541_v6 = vmul.f32 %v1932_v62, %v38_v49  ;;  %v543_v7 = vmul.f32 %v1932_v62, %v40_v51  ;;  %v540_v8 = vmul.f32 %v1934_v63, %v37_v48  ;;  %v542_v9 = vmul.f32 %v1934_v63, %v39_v50 }
  0x28   :  { %v120_v10 = vpack.c.bf16 %v90_v3, %v88_v2  ;;  %v119_v11 = vpack.c.bf16 %v89_v5, %v87_v4  ;;  %v92_v12 = vmul.f32 %v1928_v58, %v42_v55  ;;  %v94_v13 = vmul.f32 %v1928_v58, %v44_v56  ;;  %v31_v4 = vld [vmem:[%s2748_s2 + $0x50] sm:$0xff]  ;;  %v32_v5 = vld [vmem:[%s2748_s2 + $0x58] sm:$0xff] }
  0x29   :  { %v573_v14 = vpack.c.bf16 %v543_v7, %v541_v6  ;;  %v572_v15 = vpack.c.bf16 %v542_v9, %v540_v8  ;;  %v91_v17 = vmul.f32 %v1930_v59, %v41_v60  ;;  %v545_v18 = vmul.f32 %v1932_v62, %v42_v55 }
  0x2a   :  { %295 = vmatprep.mubr.bf16.mxu0 %v120_v10  ;;  %v122_v16 = vpack.c.bf16 %v94_v13, %v92_v12  ;;  %v547_v19 = vmul.f32 %v1932_v62, %v44_v56  ;;  %v93_v20 = vmul.f32 %v1930_v59, %v43_v61  ;;  %v544_v21 = vmul.f32 %v1934_v63, %v41_v60 }
  0x2b   :  { %749 = vmatprep.mubr.bf16.mxu1 %v573_v14  ;;  %296 = vmatmul.mubr.bf16.vlgmr.msra.gmra.mrb[0].mxu0 %v119_v11  ;;  %v546_v22 = vmul.f32 %v1934_v63, %v43_v61  ;;  %v96_v24 = vmul.f32 %v1928_v58, %v46_v0  ;;  %v98_v25 = vmul.f32 %v1928_v58, %v48_v1  ;;  %v49_v49 = vunpack.c.l.bf16 %v27_v28 }
  0x2c   :  { %750 = vmatmul.mubr.bf16.vlgmr.msra.gmra.mrb[0].mxu1 %v572_v15  ;;  %303 = vmatprep.mubr.bf16.mxu0 %v122_v16  ;;  %v575_v23 = vpack.c.bf16 %v547_v19, %v545_v18  ;;  %v549_v26 = vmul.f32 %v1932_v62, %v46_v0  ;;  %v551_v27 = vmul.f32 %v1932_v62, %v48_v1  ;;  %v51_v50 = vunpack.c.l.bf16 %v28_v29 }
  0x2d   :  { %v121_v30 = vpack.c.bf16 %v93_v20, %v91_v17  ;;  %v574_v33 = vpack.c.bf16 %v546_v22, %v544_v21  ;;  %v124_v34 = vpack.c.bf16 %v98_v25, %v96_v24  ;;  %v95_v38 = vmul.f32 %v1930_v59, %v45_v31  ;;  %v33_v22 = vld [vmem:[%s2748_s2 + $0x60] sm:$0xff] }
  0x2e   :  { %757 = vmatprep.mubr.bf16.mxu1 %v575_v23  ;;  %v577_v37 = vpack.c.bf16 %v551_v27, %v549_v26  ;;  %v97_v39 = vmul.f32 %v1930_v59, %v47_v32  ;;  %v548_v40 = vmul.f32 %v1934_v63, %v45_v31  ;;  %v550_v41 = vmul.f32 %v1934_v63, %v47_v32  ;;  %v34_v23 = vld [vmem:[%s2748_s2 + $0x68] sm:$0xff] }
  0x2f   :  { %v100_v42 = vmul.f32 %v1928_v58, %v50_v35  ;;  %v102_v43 = vmul.f32 %v1928_v58, %v52_v36  ;;  %v553_v44 = vmul.f32 %v1932_v62, %v50_v35  ;;  %v555_v45 = vmul.f32 %v1932_v62, %v52_v36 }
  0x30   :  { %v123_v48 = vpack.c.bf16 %v97_v39, %v95_v38  ;;  %v576_v51 = vpack.c.bf16 %v550_v41, %v548_v40  ;;  %v99_v56 = vmul.f32 %v1930_v59, %v49_v49  ;;  %v101_v57 = vmul.f32 %v1930_v59, %v51_v50  ;;  %v35_v40 = vld [vmem:[%s2748_s2 + $0x70] sm:$0xff]  ;;  %v36_v41 = vld [vmem:[%s2748_s2 + $0x78] sm:$0xff] }
  0x31   :  { %v126_v52 = vpack.c.bf16 %v102_v43, %v100_v42  ;;  %v579_v55 = vpack.c.bf16 %v555_v45, %v553_v44  ;;  %v552_v60 = vmul.f32 %v1934_v63, %v49_v49  ;;  %v554_v61 = vmul.f32 %v1934_v63, %v51_v50 }
  0x32   :  { %v104_v0 = vmul.f32 %v1928_v58, %v54_v53  ;;  %v106_v1 = vmul.f32 %v1928_v58, %v56_v54  ;;  %v557_v2 = vmul.f32 %v1932_v62, %v54_v53  ;;  %v559_v3 = vmul.f32 %v1932_v62, %v56_v54 }
  0x33   :  { %304 = vmatmul.mubr.bf16.gmra.mrb[4].mxu0 %v121_v30  ;;  %v125_v6 = vpack.c.bf16 %v101_v57, %v99_v56  ;;  %v53_v7 = vunpack.c.l.bf16 %v29_v46  ;;  %v55_v8 = vunpack.c.l.bf16 %v30_v47  ;;  %v578_v9 = vpack.c.bf16 %v554_v61, %v552_v60 }
  0x34   :  { %758 = vmatmul.mubr.bf16.gmra.mrb[4].mxu1 %v574_v33  ;;  %311 = vmatprep.mubr.bf16.mxu0 %v124_v34  ;;  %v128_v10 = vpack.c.bf16 %v106_v1, %v104_v0  ;;  %v58_v11 = vunpack.c.h.bf16 %v31_v4  ;;  %v60_v12 = vunpack.c.h.bf16 %v32_v5  ;;  %v581_v13 = vpack.c.bf16 %v559_v3, %v557_v2 }
  0x35   :  { %765 = vmatprep.mubr.bf16.mxu1 %v577_v37  ;;  %v103_v14 = vmul.f32 %v1930_v59, %v53_v7  ;;  %v105_v15 = vmul.f32 %v1930_v59, %v55_v8  ;;  %v556_v16 = vmul.f32 %v1934_v63, %v53_v7  ;;  %v558_v17 = vmul.f32 %v1934_v63, %v55_v8 }
  0x36   :  { %v108_v18 = vmul.f32 %v1928_v58, %v58_v11  ;;  %v110_v19 = vmul.f32 %v1928_v58, %v60_v12  ;;  %v561_v20 = vmul.f32 %v1932_v62, %v58_v11  ;;  %v563_v21 = vmul.f32 %v1932_v62, %v60_v12 }
  0x37   :  { %v127_v24 = vpack.c.bf16 %v105_v15, %v103_v14  ;;  %v57_v25 = vunpack.c.l.bf16 %v31_v4  ;;  %v59_v26 = vunpack.c.l.bf16 %v32_v5  ;;  %v580_v27 = vpack.c.bf16 %v558_v17, %v556_v16 }
  0x38   :  { %v130_v28 = vpack.c.bf16 %v110_v19, %v108_v18  ;;  %v62_v29 = vunpack.c.h.bf16 %v33_v22  ;;  %v64_v30 = vunpack.c.h.bf16 %v34_v23  ;;  %v583_v31 = vpack.c.bf16 %v563_v21, %v561_v20 }
  0x39   :  { %v107_v32 = vmul.f32 %v1930_v59, %v57_v25  ;;  %v109_v33 = vmul.f32 %v1930_v59, %v59_v26  ;;  %v560_v34 = vmul.f32 %v1934_v63, %v57_v25  ;;  %v562_v35 = vmul.f32 %v1934_v63, %v59_v26 }
  0x3a   :  { %v112_v36 = vmul.f32 %v1928_v58, %v62_v29  ;;  %v114_v37 = vmul.f32 %v1928_v58, %v64_v30  ;;  %v565_v38 = vmul.f32 %v1932_v62, %v62_v29  ;;  %v567_v39 = vmul.f32 %v1932_v62, %v64_v30 }
  0x3b   :  { %312 = vmatmul.mubr.bf16.gmra.mrb[8].mxu0 %v123_v48  ;;  %v129_v42 = vpack.c.bf16 %v109_v33, %v107_v32  ;;  %v61_v43 = vunpack.c.l.bf16 %v33_v22  ;;  %v63_v44 = vunpack.c.l.bf16 %v34_v23  ;;  %v582_v45 = vpack.c.bf16 %v562_v35, %v560_v34 }
  0x3c   :  { %766 = vmatmul.mubr.bf16.gmra.mrb[8].mxu1 %v576_v51  ;;  %319 = vmatprep.mubr.bf16.mxu0 %v126_v52  ;;  %v132_v46 = vpack.c.bf16 %v114_v37, %v112_v36  ;;  %v66_v47 = vunpack.c.h.bf16 %v35_v40  ;;  %v68_v48 = vunpack.c.h.bf16 %v36_v41  ;;  %v585_v49 = vpack.c.bf16 %v567_v39, %v565_v38 }
  0x3d   :  { %773 = vmatprep.mubr.bf16.mxu1 %v579_v55  ;;  %v111_v50 = vmul.f32 %v1930_v59, %v61_v43  ;;  %v113_v51 = vmul.f32 %v1930_v59, %v63_v44  ;;  %v564_v52 = vmul.f32 %v1934_v63, %v61_v43  ;;  %v566_v53 = vmul.f32 %v1934_v63, %v63_v44 }
  0x3e   :  { %v116_v54 = vmul.f32 %v1928_v58, %v66_v47  ;;  %v118_v55 = vmul.f32 %v1928_v58, %v68_v48  ;;  %v569_v56 = vmul.f32 %v1932_v62, %v66_v47  ;;  %v571_v57 = vmul.f32 %v1932_v62, %v68_v48 }
  0x3f   :  { %v131_v60 = vpack.c.bf16 %v113_v51, %v111_v50  ;;  %v65_v61 = vunpack.c.l.bf16 %v35_v40  ;;  %v67_v0 = vunpack.c.l.bf16 %v36_v41  ;;  %v584_v1 = vpack.c.bf16 %v566_v53, %v564_v52 }
  0x40   :  { %v134_v2 = vpack.c.bf16 %v118_v55, %v116_v54  ;;  %v587_v3 = vpack.c.bf16 %v571_v57, %v569_v56 }
  0x41   :  { %v115_v4 = vmul.f32 %v1930_v59, %v65_v61  ;;  %v117_v5 = vmul.f32 %v1930_v59, %v67_v0  ;;  %v568_v58 = vmul.f32 %v1934_v63, %v65_v61 }
  0x43   :  { %320 = vmatmul.mubr.bf16.gmra.mrb[12].mxu0 %v125_v6  ;;  %v570_v6 = vmul.f32 %v1934_v63, %v67_v0  ;;  %v133_v7 = vpack.c.bf16 %v117_v5, %v115_v4 }
  0x44   :  { %774 = vmatmul.mubr.bf16.gmra.mrb[12].mxu1 %v578_v9  ;;  %327 = vmatprep.mubr.bf16.mxu0 %v128_v10 }
  0x45   :  { %781 = vmatprep.mubr.bf16.mxu1 %v581_v13  ;;  %v586_v62 = vpack.c.bf16 %v570_v6, %v568_v58 }
  0x4b   :  { %328 = vmatmul.mubr.bf16.gmra.mrb[16].mxu0 %v127_v24 }
  0x4c   :  { %782 = vmatmul.mubr.bf16.gmra.mrb[16].mxu1 %v580_v27  ;;  %335 = vmatprep.mubr.bf16.mxu0 %v130_v28 }
  0x4d   :  { %789 = vmatprep.mubr.bf16.mxu1 %v583_v31 }
  0x53   :  { %336 = vmatmul.mubr.bf16.gmra.mrb[20].mxu0 %v129_v42 }
  0x54   :  { %790 = vmatmul.mubr.bf16.gmra.mrb[20].mxu1 %v582_v45  ;;  %343 = vmatprep.mubr.bf16.mxu0 %v132_v46 }
  0x55   :  { %797 = vmatprep.mubr.bf16.mxu1 %v585_v49 }
  0x5b   :  { %344 = vmatmul.mubr.bf16.gmra.mrb[24].mxu0 %v131_v60 }
  0x5c   :  { %798 = vmatmul.mubr.bf16.gmra.mrb[24].mxu1 %v584_v1  ;;  %351 = vmatprep.mubr.bf16.mxu0 %v134_v2 }
  0x5d   :  { %805 = vmatprep.mubr.bf16.mxu1 %v587_v3 }
  0x63   :  { %352 = vmatmul.mubr.bf16.gmra.mrb[28].mxu0 %v133_v7 }
  0x64   :  { %806 = vmatmul.mubr.bf16.gmra.mrb[28].mxu1 %v586_v62 }
  0xfe   :  { %v1590_v8 = vpop.f32.mrb[0].mxu0 }
  0xff   :  { %v1654_v9 = vpop.f32.mrb[0].mxu1  ;;  %v1591_v10 = vpop.f32.mrb[1].mxu0 }
 0x100   :  { %v1592_v11 = vadd.f32 %v1591_v10, %v1590_v8  ;;  %v1655_v12 = vpop.f32.mrb[1].mxu1  ;;  %v1593_v13 = vpop.f32.mrb[2].mxu0 }
 0x101   :  { %v1656_v14 = vadd.f32 %v1655_v12, %v1654_v9  ;;  %v1657_v59 = vpop.f32.mrb[2].mxu1  ;;  %v1594_v15 = vpop.f32.mrb[3].mxu0 }
 0x102   :  { %361 = vst.msk [vmem:[%s2749_s5] sm:$0xff] %vm360_vm0, %v1592_v11  ;;  %v1595_v63 = vadd.f32 %v1594_v15, %v1593_v13  ;;  %v1658_v16 = vpop.f32.mrb[3].mxu1  ;;  %v377_v17 = vsel %vm360_vm0, %v1592_v11, 0.0  ;;  %v441_v35 = vmul.f32 %v1592_v11, %v1592_v11 }
 0x103   :  { %1526 = vst.msk [vmem:[%s2749_s5 + $0x80] sm:$0xff] %vm360_vm0, %v1656_v14  ;;  %v1659_v18 = vadd.f32 %v1658_v16, %v1657_v59  ;;  %378 = vadd.xlane.f32.xlu0 %v377_v17  ;;  %v831_v21 = vsel %vm360_vm0, %v1656_v14, 0.0  ;;  %v895_v40 = vmul.f32 %v1656_v14, %v1656_v14 }
 0x104   :  { %362 = vst.msk [vmem:[%s2749_s5 + $0x8] sm:$0xff] %vm360_vm0, %v1595_v63  ;;  %v442_v20 = vmul.f32 %v1595_v63, %v1595_v63  ;;  %v380_v33 = vsel %vm360_vm0, %v1595_v63, 0.0  ;;  %v457_v39 = vsel %vm360_vm0, %v441_v35, 0.0 }
 0x105   :  { %1527 = vst.msk [vmem:[%s2749_s5 + $0x88] sm:$0xff] %vm360_vm0, %v1659_v18  ;;  %v834_v19 = vsel %vm360_vm0, %v1659_v18, 0.0  ;;  %v896_v30 = vmul.f32 %v1659_v18, %v1659_v18  ;;  %v911_v51 = vsel %vm360_vm0, %v895_v40, 0.0 }
 0x106   :  { %835 = vadd.xlane.f32.xlu1 %v834_v19  ;;  %v1596_v22 = vpop.f32.mrb[4].mxu0  ;;  %v460_v28 = vsel %vm360_vm0, %v442_v20, 0.0 }
 0x107   :  { %832 = vadd.xlane.f32.xlu0 %v831_v21  ;;  %v1597_v23 = vpop.f32.mrb[5].mxu0  ;;  %v1660_v24 = vpop.f32.mrb[4].mxu1  ;;  %v914_v38 = vsel %vm360_vm0, %v896_v30, 0.0 }
 0x108   :  { %v1598_v25 = vadd.f32 %v1597_v23, %v1596_v22  ;;  %v1599_v26 = vpop.f32.mrb[6].mxu0  ;;  %v1661_v27 = vpop.f32.mrb[5].mxu1 }
 0x109   :  { %v1600_v29 = vpop.f32.mrb[7].mxu0  ;;  %v1662_v31 = vadd.f32 %v1661_v27, %v1660_v24  ;;  %v1663_v32 = vpop.f32.mrb[6].mxu1 }
 0x10a   :  { %461 = vadd.xlane.f32.xlu1 %v460_v28  ;;  %363 = vst.msk [vmem:[%s2749_s5 + $0x10] sm:$0xff] %vm360_vm0, %v1598_v25  ;;  %v1601_v34 = vadd.f32 %v1600_v29, %v1599_v26  ;;  %v1664_v36 = vpop.f32.mrb[7].mxu1  ;;  %v383_v42 = vsel %vm360_vm0, %v1598_v25, 0.0  ;;  %v443_v57 = vmul.f32 %v1598_v25, %v1598_v25 }
 0x10b   :  { %381 = vadd.xlane.f32.xlu0 %v380_v33  ;;  %1528 = vst.msk [vmem:[%s2749_s5 + $0x90] sm:$0xff] %vm360_vm0, %v1662_v31  ;;  %v1665_v37 = vadd.f32 %v1664_v36, %v1663_v32  ;;  %v837_v55 = vsel %vm360_vm0, %v1662_v31, 0.0  ;;  %v897_v8 = vmul.f32 %v1662_v31, %v1662_v31 }
 0x10c   :  { %364 = vst.msk [vmem:[%s2749_s5 + $0x18] sm:$0xff] %vm360_vm0, %v1601_v34  ;;  %v386_v56 = vsel %vm360_vm0, %v1601_v34, 0.0  ;;  %v444_v5 = vmul.f32 %v1601_v34, %v1601_v34  ;;  %v463_v62 = vsel %vm360_vm0, %v443_v57, 0.0 }
 0x10d   :  { %1529 = vst.msk [vmem:[%s2749_s5 + $0x98] sm:$0xff] %vm360_vm0, %v1665_v37  ;;  %v840_v4 = vsel %vm360_vm0, %v1665_v37, 0.0  ;;  %v898_v13 = vmul.f32 %v1665_v37, %v1665_v37  ;;  %v917_v14 = vsel %vm360_vm0, %v897_v8, 0.0 }
 0x10e   :  { %915 = vadd.xlane.f32.xlu1 %v914_v38  ;;  %v1602_v41 = vpop.f32.mrb[8].mxu0  ;;  %v466_v12 = vsel %vm360_vm0, %v444_v5, 0.0 }
 0x10f   :  { %458 = vadd.xlane.f32.xlu0 %v457_v39  ;;  %v1603_v43 = vpop.f32.mrb[9].mxu0  ;;  %v1666_v44 = vpop.f32.mrb[8].mxu1  ;;  %v920_v20 = vsel %vm360_vm0, %v898_v13, 0.0 }
 0x110   :  { %v2070_v45 = vadd.f32 %v1603_v43, %v1602_v41  ;;  %v1605_v46 = vpop.f32.mrb[10].mxu0  ;;  %v1667_v47 = vpop.f32.mrb[9].mxu1 }
 0x111   :  { %v1606_v48 = vpop.f32.mrb[11].mxu0  ;;  %v2072_v49 = vadd.f32 %v1667_v47, %v1666_v44  ;;  %v1669_v50 = vpop.f32.mrb[10].mxu1 }
 0x112   :  { %384 = vadd.xlane.f32.xlu1 %v383_v42  ;;  %365 = vst.msk [vmem:[%s2749_s5 + $0x20] sm:$0xff] %vm360_vm0, %v2070_v45  ;;  %v2080_v52 = vadd.f32 %v1606_v48, %v1605_v46  ;;  %v1670_v53 = vpop.f32.mrb[11].mxu1  ;;  %v389_v16 = vsel %vm360_vm0, %v2070_v45, 0.0  ;;  %v445_v29 = vmul.f32 %v2070_v45, %v2070_v45 }
 0x113   :  { %912 = vadd.xlane.f32.xlu0 %v911_v51  ;;  %1530 = vst.msk [vmem:[%s2749_s5 + $0xa0] sm:$0xff] %vm360_vm0, %v2072_v49  ;;  %v2087_v54 = vadd.f32 %v1670_v53, %v1669_v50  ;;  %v843_v27 = vsel %vm360_vm0, %v2072_v49, 0.0  ;;  %v899_v42 = vmul.f32 %v2072_v49, %v2072_v49 }
 0x114   :  { %366 = vst.msk [vmem:[%s2749_s5 + $0x28] sm:$0xff] %vm360_vm0, %v2080_v52  ;;  %v392_v28 = vsel %vm360_vm0, %v2080_v52, 0.0  ;;  %v446_v37 = vmul.f32 %v2080_v52, %v2080_v52  ;;  %v469_v41 = vsel %vm360_vm0, %v445_v29, 0.0 }
 0x115   :  { %1531 = vst.msk [vmem:[%s2749_s5 + $0xa8] sm:$0xff] %vm360_vm0, %v2087_v54  ;;  %v846_v36 = vsel %vm360_vm0, %v2087_v54, 0.0  ;;  %v900_v47 = vmul.f32 %v2087_v54, %v2087_v54  ;;  %v923_v48 = vsel %vm360_vm0, %v899_v42, 0.0 }
 0x116   :  { %387 = vadd.xlane.f32.xlu1 %v386_v56  ;;  %v1608_v60 = vpop.f32.mrb[12].mxu0  ;;  %v472_v46 = vsel %vm360_vm0, %v446_v37, 0.0 }
 0x117   :  { %838 = vadd.xlane.f32.xlu0 %v837_v55  ;;  %v1609_v61 = vpop.f32.mrb[13].mxu0  ;;  %v1672_v0 = vpop.f32.mrb[12].mxu1  ;;  %v926_v56 = vsel %vm360_vm0, %v900_v47, 0.0 }
 0x118   :  { %v2101_v1 = vadd.f32 %v1609_v61, %v1608_v60  ;;  %v1611_v2 = vpop.f32.mrb[14].mxu0  ;;  %v1673_v3 = vpop.f32.mrb[13].mxu1 }
 0x119   :  { %v1612_v58 = vpop.f32.mrb[15].mxu0  ;;  %v2104_v6 = vadd.f32 %v1673_v3, %v1672_v0  ;;  %v1675_v7 = vpop.f32.mrb[14].mxu1  ;;  %v1777_v3 = vmov 0  }
 0x11a   :  { %841 = vadd.xlane.f32.xlu1 %v840_v4  ;;  %367 = vst.msk [vmem:[%s2749_s5 + $0x30] sm:$0xff] %vm360_vm0, %v2101_v1  ;;  %v2112_v9 = vadd.f32 %v1612_v58, %v1611_v2  ;;  %v1676_v10 = vpop.f32.mrb[15].mxu1  ;;  %v395_v52 = vsel %vm360_vm0, %v2101_v1, 0.0  ;;  %1703 = vset.pattern.permute.xlu0 %v1777_v3 }
 0x11b   :  { %464 = vadd.xlane.f32.xlu0 %v463_v62  ;;  %1532 = vst.msk [vmem:[%s2749_s5 + $0xb0] sm:$0xff] %vm360_vm0, %v2104_v6  ;;  %v2119_v11 = vadd.f32 %v1676_v10, %v1675_v7  ;;  %1704 = vset.pattern.permute.xlu1 %v1777_v3  ;;  %v849_v5 = vsel %vm360_vm0, %v2104_v6, 0.0  ;;  %v447_v7 = vmul.f32 %v2101_v1, %v2101_v1 }
 0x11c   :  { %368 = vst.msk [vmem:[%s2749_s5 + $0x38] sm:$0xff] %vm360_vm0, %v2112_v9  ;;  %v398_v58 = vsel %vm360_vm0, %v2112_v9, 0.0 }
 0x11d   :  { %1533 = vst.msk [vmem:[%s2749_s5 + $0xb8] sm:$0xff] %vm360_vm0, %v2119_v11  ;;  %v475_v1 = vsel %vm360_vm0, %v447_v7, 0.0 }
 0x11e   :  { %467 = vadd.xlane.f32.xlu1 %v466_v12  ;;  %v1614_v59 = vpop.f32.mrb[16].mxu0 }
 0x11f   :  { %918 = vadd.xlane.f32.xlu0 %v917_v14  ;;  %v1615_v15 = vpop.f32.mrb[17].mxu0  ;;  %v1678_v63 = vpop.f32.mrb[16].mxu1 }
 0x120   :  { %v2135_v17 = vadd.f32 %v1615_v15, %v1614_v59  ;;  %v1617_v18 = vpop.f32.mrb[18].mxu0  ;;  %v1679_v19 = vpop.f32.mrb[17].mxu1  ;;  %v852_v59 = vsel %vm360_vm0, %v2119_v11, 0.0  ;;  %v448_v15 = vmul.f32 %v2112_v9, %v2112_v9 }
 0x121   :  { %v1618_v21 = vpop.f32.mrb[19].mxu0  ;;  %v2138_v22 = vadd.f32 %v1679_v19, %v1678_v63  ;;  %v1681_v23 = vpop.f32.mrb[18].mxu1  ;;  %v901_v19 = vmul.f32 %v2104_v6, %v2104_v6 }
 0x122   :  { %921 = vadd.xlane.f32.xlu1 %v920_v20  ;;  %369 = vst.msk [vmem:[%s2749_s5 + $0x40] sm:$0xff] %vm360_vm0, %v2135_v17  ;;  %v2145_v24 = vadd.f32 %v1618_v21, %v1617_v18  ;;  %v1682_v25 = vpop.f32.mrb[19].mxu1  ;;  %v478_v6 = vsel %vm360_vm0, %v448_v15, 0.0 }
 0x123   :  { %390 = vadd.xlane.f32.xlu0 %v389_v16  ;;  %1534 = vst.msk [vmem:[%s2749_s5 + $0xc0] sm:$0xff] %vm360_vm0, %v2138_v22  ;;  %v2152_v26 = vadd.f32 %v1682_v25, %v1681_v23  ;;  %v902_v23 = vmul.f32 %v2119_v11, %v2119_v11  ;;  %v929_v25 = vsel %vm360_vm0, %v901_v19, 0.0  ;;  %v855_v11 = vsel %vm360_vm0, %v2138_v22, 0.0 }
 0x124   :  { %370 = vst.msk [vmem:[%s2749_s5 + $0x48] sm:$0xff] %vm360_vm0, %v2145_v24  ;;  %v404_v29 = vsel %vm360_vm0, %v2145_v24, 0.0 }
 0x125   :  { %1535 = vst.msk [vmem:[%s2749_s5 + $0xc8] sm:$0xff] %vm360_vm0, %v2152_v26  ;;  %v904_v37 = vmul.f32 %v2152_v26, %v2152_v26 }
 0x126   :  { %393 = vadd.xlane.f32.xlu1 %v392_v28  ;;  %v1620_v30 = vpop.f32.mrb[20].mxu0  ;;  %v932_v28 = vsel %vm360_vm0, %v902_v23, 0.0 }
 0x127   :  { %844 = vadd.xlane.f32.xlu0 %v843_v27  ;;  %v1621_v31 = vpop.f32.mrb[21].mxu0  ;;  %v1684_v32 = vpop.f32.mrb[20].mxu1  ;;  %v401_v27 = vsel %vm360_vm0, %v2135_v17, 0.0 }
 0x128   :  { %v2170_v33 = vadd.f32 %v1621_v31, %v1620_v30  ;;  %v1623_v34 = vpop.f32.mrb[22].mxu0  ;;  %v1685_v35 = vpop.f32.mrb[21].mxu1  ;;  %v449_v30 = vmul.f32 %v2135_v17, %v2135_v17  ;;  %v858_v31 = vsel %vm360_vm0, %v2152_v26, 0.0 }
 0x129   :  { %v1624_v38 = vpop.f32.mrb[23].mxu0  ;;  %v2176_v39 = vadd.f32 %v1685_v35, %v1684_v32  ;;  %v1687_v40 = vpop.f32.mrb[22].mxu1  ;;  %v450_v32 = vmul.f32 %v2145_v24, %v2145_v24  ;;  %v903_v35 = vmul.f32 %v2138_v22, %v2138_v22  ;;  %v938_v24 = vsel %vm360_vm0, %v904_v37, 0.0 }
 0x12a   :  { %847 = vadd.xlane.f32.xlu1 %v846_v36  ;;  %371 = vst.msk [vmem:[%s2749_s5 + $0x50] sm:$0xff] %vm360_vm0, %v2170_v33  ;;  %v2186_v43 = vadd.f32 %v1624_v38, %v1623_v34  ;;  %v1688_v44 = vpop.f32.mrb[23].mxu1  ;;  %v481_v34 = vsel %vm360_vm0, %v449_v30, 0.0  ;;  %v407_v38 = vsel %vm360_vm0, %v2170_v33, 0.0  ;;  %v451_v26 = vmul.f32 %v2170_v33, %v2170_v33 }
 0x12b   :  { %470 = vadd.xlane.f32.xlu0 %v469_v41  ;;  %1536 = vst.msk [vmem:[%s2749_s5 + $0xd0] sm:$0xff] %vm360_vm0, %v2176_v39  ;;  %v2193_v45 = vadd.f32 %v1688_v44, %v1687_v40  ;;  %v484_v36 = vsel %vm360_vm0, %v450_v32, 0.0  ;;  %v935_v17 = vsel %vm360_vm0, %v903_v35, 0.0  ;;  %v861_v22 = vsel %vm360_vm0, %v2176_v39, 0.0 }
 0x12c   :  { %372 = vst.msk [vmem:[%s2749_s5 + $0x58] sm:$0xff] %vm360_vm0, %v2186_v43  ;;  %v410_v40 = vsel %vm360_vm0, %v2186_v43, 0.0  ;;  %v452_v42 = vmul.f32 %v2186_v43, %v2186_v43  ;;  %v487_v44 = vsel %vm360_vm0, %v451_v26, 0.0 }
 0x12d   :  { %1537 = vst.msk [vmem:[%s2749_s5 + $0xd8] sm:$0xff] %vm360_vm0, %v2193_v45  ;;  %v864_v41 = vsel %vm360_vm0, %v2193_v45, 0.0 }
 0x12e   :  { %473 = vadd.xlane.f32.xlu1 %v472_v46  ;;  %v1626_v49 = vpop.f32.mrb[24].mxu0  ;;  %v905_v46 = vmul.f32 %v2176_v39, %v2176_v39  ;;  %v490_v47 = vsel %vm360_vm0, %v452_v42, 0.0 }
 0x12f   :  { %924 = vadd.xlane.f32.xlu0 %v923_v48  ;;  %v1627_v50 = vpop.f32.mrb[25].mxu0  ;;  %v1690_v51 = vpop.f32.mrb[24].mxu1  ;;  %v906_v48 = vmul.f32 %v2193_v45, %v2193_v45 }
 0x130   :  { %v2211_v53 = vadd.f32 %v1627_v50, %v1626_v49  ;;  %v1629_v55 = vpop.f32.mrb[26].mxu0  ;;  %v1691_v54 = vpop.f32.mrb[25].mxu1  ;;  %v941_v33 = vsel %vm360_vm0, %v905_v46, 0.0 }
 0x131   :  { %v1630_v57 = vpop.f32.mrb[27].mxu0  ;;  %v2214_v60 = vadd.f32 %v1691_v54, %v1690_v51  ;;  %v1693_v61 = vpop.f32.mrb[26].mxu1  ;;  %v944_v43 = vsel %vm360_vm0, %v906_v48, 0.0 }
 0x132   :  { %927 = vadd.xlane.f32.xlu1 %v926_v56  ;;  %373 = vst.msk [vmem:[%s2749_s5 + $0x60] sm:$0xff] %vm360_vm0, %v2211_v53  ;;  %v2221_v0 = vadd.f32 %v1630_v57, %v1629_v55  ;;  %v1694_v2 = vpop.f32.mrb[27].mxu1  ;;  %v413_v49 = vsel %vm360_vm0, %v2211_v53, 0.0  ;;  %v453_v45 = vmul.f32 %v2211_v53, %v2211_v53 }
 0x133   :  { %396 = vadd.xlane.f32.xlu0 %v395_v52  ;;  %1538 = vst.msk [vmem:[%s2749_s5 + $0xe0] sm:$0xff] %vm360_vm0, %v2214_v60  ;;  %v2228_v4 = vadd.f32 %v1694_v2, %v1693_v61  ;;  %v867_v39 = vsel %vm360_vm0, %v2214_v60, 0.0  ;;  %v907_v54 = vmul.f32 %v2214_v60, %v2214_v60 }
 0x134   :  { %374 = vst.msk [vmem:[%s2749_s5 + $0x68] sm:$0xff] %vm360_vm0, %v2221_v0  ;;  %v416_v50 = vsel %vm360_vm0, %v2221_v0, 0.0  ;;  %v454_v52 = vmul.f32 %v2221_v0, %v2221_v0  ;;  %v493_v55 = vsel %vm360_vm0, %v453_v45, 0.0 }
 0x135   :  { %1539 = vst.msk [vmem:[%s2749_s5 + $0xe8] sm:$0xff] %vm360_vm0, %v2228_v4  ;;  %v870_v51 = vsel %vm360_vm0, %v2228_v4, 0.0  ;;  %v908_v57 = vmul.f32 %v2228_v4, %v2228_v4  ;;  %v947_v53 = vsel %vm360_vm0, %v907_v54, 0.0 }
 0x136   :  { %399 = vadd.xlane.f32.xlu1 %v398_v58  ;;  %v1632_v62 = vpop.f32.mrb[28].mxu0  ;;  %v496_v56 = vsel %vm360_vm0, %v454_v52, 0.0 }
 0x137   :  { %850 = vadd.xlane.f32.xlu0 %v849_v5  ;;  %v1633_v8 = vpop.f32.mrb[29].mxu0  ;;  %v1696_v10 = vpop.f32.mrb[28].mxu1  ;;  %v950_v0 = vsel %vm360_vm0, %v908_v57, 0.0  ;;  %v1087_v57 = vld [vmem:[%s2750_s3] sm:$0xff] }
 0x138   :  { %v2246_v12 = vadd.f32 %v1633_v8, %v1632_v62  ;;  %v1635_v13 = vpop.f32.mrb[30].mxu0  ;;  %v1697_v14 = vpop.f32.mrb[29].mxu1 }
 0x139   :  { %v1636_v63 = vpop.f32.mrb[31].mxu0  ;;  %v2252_v16 = vadd.f32 %v1697_v14, %v1696_v10  ;;  %v1699_v18 = vpop.f32.mrb[30].mxu1 }
 0x13a   :  { %853 = vadd.xlane.f32.xlu1 %v852_v59  ;;  %375 = vst.msk [vmem:[%s2749_s5 + $0x70] sm:$0xff] %vm360_vm0, %v2246_v12  ;;  %v2262_v20 = vadd.f32 %v1636_v63, %v1635_v13  ;;  %v1700_v21 = vpop.f32.mrb[31].mxu1  ;;  %v419_v61 = vsel %vm360_vm0, %v2246_v12, 0.0  ;;  %v455_v3 = vmul.f32 %v2246_v12, %v2246_v12 }
 0x13b   :  { %476 = vadd.xlane.f32.xlu0 %v475_v1  ;;  %1540 = vst.msk [vmem:[%s2749_s5 + $0xf0] sm:$0xff] %vm360_vm0, %v2252_v16  ;;  %v2269_v9 = vadd.f32 %v1700_v21, %v1699_v18  ;;  %v873_v60 = vsel %vm360_vm0, %v2252_v16, 0.0  ;;  %v909_v7 = vmul.f32 %v2252_v16, %v2252_v16 }
 0x13c   :  { %376 = vst.msk [vmem:[%s2749_s5 + $0x78] sm:$0xff] %vm360_vm0, %v2262_v20  ;;  %v422_v2 = vsel %vm360_vm0, %v2262_v20, 0.0  ;;  %v456_v5 = vmul.f32 %v2262_v20, %v2262_v20  ;;  %v499_v58 = vsel %vm360_vm0, %v455_v3, 0.0 }
 0x13d   :  { %1541 = vst.msk [vmem:[%s2749_s5 + $0xf8] sm:$0xff] %vm360_vm0, %v2269_v9  ;;  %v876_v4 = vsel %vm360_vm0, %v2269_v9, 0.0  ;;  %v910_v8 = vmul.f32 %v2269_v9, %v2269_v9  ;;  %v953_v10 = vsel %vm360_vm0, %v909_v7, 0.0  ;;  %v1120_v7 = vld [vmem:[%s2751_s4 + $0x8] sm:$0xff] }
 0x13e   :  { %479 = vadd.xlane.f32.xlu1 %v478_v6  ;;  %v502_v62 = vsel %vm360_vm0, %v456_v5, 0.0 }
 0x13f   :  { %930 = vadd.xlane.f32.xlu0 %v929_v25  ;;  %v956_v12 = vsel %vm360_vm0, %v910_v8, 0.0 }
 0x142   :  { %933 = vadd.xlane.f32.xlu1 %v932_v28 }
 0x143   :  { %402 = vadd.xlane.f32.xlu0 %v401_v27 }
 0x146   :  { %405 = vadd.xlane.f32.xlu1 %v404_v29 }
 0x147   :  { %856 = vadd.xlane.f32.xlu0 %v855_v11 }
 0x14a   :  { %859 = vadd.xlane.f32.xlu1 %v858_v31 }
 0x14b   :  { %482 = vadd.xlane.f32.xlu0 %v481_v34 }
 0x14e   :  { %485 = vadd.xlane.f32.xlu1 %v484_v36 }
 0x14f   :  { %936 = vadd.xlane.f32.xlu0 %v935_v17 }
 0x152   :  { %939 = vadd.xlane.f32.xlu1 %v938_v24 }
 0x153   :  { %408 = vadd.xlane.f32.xlu0 %v407_v38 }
 0x156   :  { %411 = vadd.xlane.f32.xlu1 %v410_v40 }
 0x157   :  { %862 = vadd.xlane.f32.xlu0 %v861_v22 }
 0x15a   :  { %865 = vadd.xlane.f32.xlu1 %v864_v41 }
 0x15b   :  { %488 = vadd.xlane.f32.xlu0 %v487_v44 }
 0x15e   :  { %491 = vadd.xlane.f32.xlu1 %v490_v47  ;;  %v1088_v47 = vld [vmem:[%s2750_s3 + $0x8] sm:$0xff] }
 0x15f   :  { %942 = vadd.xlane.f32.xlu0 %v941_v33 }
 0x162   :  { %945 = vadd.xlane.f32.xlu1 %v944_v43 }
 0x163   :  { %414 = vadd.xlane.f32.xlu0 %v413_v49 }
 0x166   :  { %417 = vadd.xlane.f32.xlu1 %v416_v50 }
 0x167   :  { %868 = vadd.xlane.f32.xlu0 %v867_v39 }
 0x16a   :  { %871 = vadd.xlane.f32.xlu1 %v870_v51 }
 0x16b   :  { %494 = vadd.xlane.f32.xlu0 %v493_v55 }
 0x16e   :  { %497 = vadd.xlane.f32.xlu1 %v496_v56 }
 0x16f   :  { %948 = vadd.xlane.f32.xlu0 %v947_v53 }
 0x172   :  { %951 = vadd.xlane.f32.xlu1 %v950_v0 }
 0x173   :  { %420 = vadd.xlane.f32.xlu0 %v419_v61 }
 0x176   :  { %423 = vadd.xlane.f32.xlu1 %v422_v2 }
 0x177   :  { %874 = vadd.xlane.f32.xlu0 %v873_v60 }
 0x17a   :  { %877 = vadd.xlane.f32.xlu1 %v876_v4 }
 0x17b   :  { %500 = vadd.xlane.f32.xlu0 %v499_v58 }
 0x17e   :  { %503 = vadd.xlane.f32.xlu1 %v502_v62  ;;  %v1119_v62 = vld [vmem:[%s2751_s4] sm:$0xff] }
 0x17f   :  { %954 = vadd.xlane.f32.xlu0 %v953_v10 }
 0x182   :  { %957 = vadd.xlane.f32.xlu1 %v956_v12 }
 0x190   :  { %v379_v13 = vpop.xlane.xlu0 %378 }
 0x193   :  { %v836_v14 = vpop.xlane.xlu1 %835 }
 0x194   :  { %v833_v59 = vpop.xlane.xlu0 %832 }
 0x195   :  { %v879_v16 = vadd.f32 %v833_v59, %v379_v13 }
 0x197   :  { %v462_v15 = vpop.xlane.xlu1 %461  ;;  %v975_v23 = vmul.f32 0.010204081, %v879_v16 }
 0x198   :  { %v382_v63 = vpop.xlane.xlu0 %381 }
 0x199   :  { %v880_v18 = vadd.f32 %v836_v14, %v382_v63  ;;  %v1007_v30 = vmul.f32 %v975_v23, %v975_v23 }
 0x19b   :  { %v976_v1 = vmul.f32 0.010204081, %v880_v18  ;;  %v916_v19 = vpop.xlane.xlu1 %915 }
 0x19c   :  { %v960_v20 = vadd.f32 %v916_v19, %v462_v15  ;;  %v459_v21 = vpop.xlane.xlu0 %458 }
 0x19d   :  { %v1008_v6 = vmul.f32 %v976_v1, %v976_v1 }
 0x19e   :  { %v992_v9 = vmul.f32 0.010204081, %v960_v20 }
 0x19f   :  { %v385_v25 = vpop.xlane.xlu1 %384 }
 0x1a0   :  { %v1024_v27 = vsub.f32 %v992_v9, %v1008_v6  ;;  %v913_v28 = vpop.xlane.xlu0 %912  ;;  %v1089_v6 = vld [vmem:[%s2750_s3 + $0x10] sm:$0xff] }
 0x1a1   :  { %v959_v11 = vadd.f32 %v913_v28, %v459_v21 }
 0x1a2   :  { %v1040_v29 = vmax.f32 %v1024_v27, 0.0 }
 0x1a3   :  { %v991_v31 = vmul.f32 0.010204081, %v959_v11  ;;  %v388_v32 = vpop.xlane.xlu1 %387 }
 0x1a4   :  { %v1056_v34 = vadd.f32 0.001, %v1040_v29  ;;  %v839_v35 = vpop.xlane.xlu0 %838 }
 0x1a5   :  { %v1023_v36 = vsub.f32 %v991_v31, %v1007_v30  ;;  %v881_v17 = vadd.f32 %v839_v35, %v385_v25  ;;  %v1090_v30 = vld [vmem:[%s2750_s3 + $0x18] sm:$0xff] }
 0x1a6   :  { %1745 = vrsqrt.f32 %v1056_v34 }
 0x1a7   :  { %v1039_v37 = vmax.f32 %v1023_v36, 0.0  ;;  %v842_v38 = vpop.xlane.xlu1 %841  ;;  %v2366_v26 = vmul.f32 0.010204081, %v881_v17 }
 0x1a8   :  { %v465_v24 = vpop.xlane.xlu0 %464  ;;  %v882_v40 = vadd.f32 %v842_v38, %v388_v32 }
 0x1a9   :  { %v1055_v22 = vadd.f32 0.001, %v1039_v37  ;;  %v1009_v48 = vmul.f32 %v2366_v26, %v2366_v26 }
 0x1aa   :  { %v2368_v46 = vmul.f32 0.010204081, %v882_v40 }
 0x1ab   :  { %1747 = vrsqrt.f32 %v1055_v22  ;;  %v468_v41 = vpop.xlane.xlu1 %467 }
 0x1ac   :  { %v919_v42 = vpop.xlane.xlu0 %918  ;;  %v1010_v52 = vmul.f32 %v2368_v46, %v2368_v46 }
 0x1ad   :  { %v961_v44 = vadd.f32 %v919_v42, %v465_v24  ;;  %v1122_v24 = vld [vmem:[%s2751_s4 + $0x18] sm:$0xff] }
 0x1af   :  { %v993_v33 = vmul.f32 0.010204081, %v961_v44  ;;  %v922_v49 = vpop.xlane.xlu1 %921  ;;  %v1121_v44 = vld [vmem:[%s2751_s4 + $0x10] sm:$0xff] }
 0x1b0   :  { %v1746_v43 = vpop.eup %1745  ;;  %v962_v39 = vadd.f32 %v922_v49, %v468_v41  ;;  %v391_v50 = vpop.xlane.xlu0 %390 }
 0x1b1   :  { %v1025_v45 = vsub.f32 %v993_v33, %v1009_v48  ;;  %v1104_v51 = vmul.f32 %v1746_v43, %v1088_v47 }
 0x1b2   :  { %v994_v55 = vmul.f32 0.010204081, %v962_v39 }
 0x1b3   :  { %v1041_v54 = vmax.f32 %v1025_v45, 0.0  ;;  %v394_v56 = vpop.xlane.xlu1 %393  ;;  %1190 = vperm.xlu1 %1704, %v1104_v51   ;;  %v1136_v4 = vmul.f32 %v1104_v51, %v976_v1 }
 0x1b4   :  { %v1026_v53 = vsub.f32 %v994_v55, %v1010_v52  ;;  %v845_v61 = vpop.xlane.xlu0 %844 }
 0x1b5   :  { %v1748_v0 = vpop.eup %1747  ;;  %v1057_v60 = vadd.f32 0.001, %v1041_v54  ;;  %v883_v5 = vadd.f32 %v845_v61, %v391_v50  ;;  %v1152_v14 = vsub.f32 %v1120_v7, %v1136_v4  ;;  %v1091_v54 = vld [vmem:[%s2750_s3 + $0x20] sm:$0xff] }
 0x1b6   :  { %v1042_v2 = vmax.f32 %v1026_v53, 0.0  ;;  %v1103_v3 = vmul.f32 %v1748_v0, %v1087_v57 }
 0x1b7   :  { %1749 = vrsqrt.f32 %v1057_v60  ;;  %v848_v58 = vpop.xlane.xlu1 %847  ;;  %v2386_v15 = vmul.f32 0.010204081, %v883_v5 }
 0x1b8   :  { %v1058_v8 = vadd.f32 0.001, %v1042_v2  ;;  %1185 = vperm.xlu0 %1703, %v1103_v3   ;;  %v471_v10 = vpop.xlane.xlu0 %470  ;;  %v1135_v12 = vmul.f32 %v1103_v3, %v975_v23  ;;  %v884_v13 = vadd.f32 %v848_v58, %v394_v56  ;;  %v1092_v3 = vld [vmem:[%s2750_s3 + $0x28] sm:$0xff] }
 0x1b9   :  { %v1011_v19 = vmul.f32 %v2386_v15, %v2386_v15 }
 0x1ba   :  { %1751 = vrsqrt.f32 %v1058_v8  ;;  %v1151_v59 = vsub.f32 %v1119_v62, %v1135_v12  ;;  %v2388_v1 = vmul.f32 0.010204081, %v884_v13  ;;  %v1124_v13 = vld [vmem:[%s2751_s4 + $0x28] sm:$0xff] }
 0x1bb   :  { %v474_v63 = vpop.xlane.xlu1 %473 }
 0x1bc   :  { %1286 = vperm.xlu0 %1703, %v1152_v14   ;;  %1281 = vperm.xlu1 %1704, %v1151_v59   ;;  %v925_v18 = vpop.xlane.xlu0 %924  ;;  %v1012_v28 = vmul.f32 %v2388_v1, %v2388_v1 }
 0x1bd   :  { %v963_v16 = vadd.f32 %v925_v18, %v471_v10 }
 0x1bf   :  { %v995_v20 = vmul.f32 0.010204081, %v963_v16  ;;  %v928_v21 = vpop.xlane.xlu1 %927  ;;  %v1123_v16 = vld [vmem:[%s2751_s4 + $0x20] sm:$0xff] }
 0x1c0   :  { %v964_v9 = vadd.f32 %v928_v21, %v474_v63  ;;  %v397_v23 = vpop.xlane.xlu0 %396 }
 0x1c1   :  { %v1750_v25 = vpop.eup %1749  ;;  %v1027_v27 = vsub.f32 %v995_v20, %v1011_v19 }
 0x1c2   :  { %v996_v11 = vmul.f32 0.010204081, %v964_v9  ;;  %v1105_v29 = vmul.f32 %v1750_v25, %v1089_v6 }
 0x1c3   :  { %v1043_v31 = vmax.f32 %v1027_v27, 0.0  ;;  %v400_v32 = vpop.xlane.xlu1 %399 }
 0x1c4   :  { %v1752_v34 = vpop.eup %1751  ;;  %v1028_v35 = vsub.f32 %v996_v11, %v1012_v28  ;;  %1195 = vperm.xlu1 %1704, %v1105_v29   ;;  %v851_v36 = vpop.xlane.xlu0 %850  ;;  %v1137_v22 = vmul.f32 %v1105_v29, %v2366_v26 }
 0x1c5   :  { %v1059_v37 = vadd.f32 0.001, %v1043_v31  ;;  %v1106_v17 = vmul.f32 %v1752_v34, %v1090_v30  ;;  %v885_v40 = vadd.f32 %v851_v36, %v397_v23  ;;  %v1093_v30 = vld [vmem:[%s2750_s3 + $0x30] sm:$0xff] }
 0x1c6   :  { %v1044_v38 = vmax.f32 %v1028_v35, 0.0  ;;  %v1153_v43 = vsub.f32 %v1121_v44, %v1137_v22 }
 0x1c7   :  { %1753 = vrsqrt.f32 %v1059_v37  ;;  %v854_v41 = vpop.xlane.xlu1 %853  ;;  %v1138_v42 = vmul.f32 %v1106_v17, %v2368_v46  ;;  %v2408_v39 = vmul.f32 0.010204081, %v885_v40 }
 0x1c8   :  { %v1060_v47 = vadd.f32 0.001, %v1044_v38  ;;  %1200 = vperm.xlu1 %1704, %v1106_v17   ;;  %v477_v48 = vpop.xlane.xlu0 %476  ;;  %v886_v49 = vadd.f32 %v854_v41, %v400_v32  ;;  %v1094_v38 = vld [vmem:[%s2750_s3 + $0x38] sm:$0xff] }
 0x1c9   :  { %v1154_v33 = vsub.f32 %v1122_v24, %v1138_v42  ;;  %v1013_v46 = vmul.f32 %v2408_v39, %v2408_v39 }
 0x1ca   :  { %1755 = vrsqrt.f32 %v1060_v47  ;;  %v2410_v51 = vmul.f32 0.010204081, %v886_v49 }
 0x1cb   :  { %v480_v50 = vpop.xlane.xlu1 %479  ;;  %1296 = vperm.xlu0 %1703, %v1154_v33   ;;  %v1126_v33 = vld [vmem:[%s2751_s4 + $0x38] sm:$0xff] }
 0x1cc   :  { %1291 = vperm.xlu1 %1704, %v1153_v43   ;;  %v931_v26 = vpop.xlane.xlu0 %930  ;;  %v1014_v0 = vmul.f32 %v2410_v51, %v2410_v51 }
 0x1cd   :  { %v965_v45 = vadd.f32 %v931_v26, %v477_v48 }
 0x1cf   :  { %v997_v52 = vmul.f32 0.010204081, %v965_v45  ;;  %v934_v55 = vpop.xlane.xlu1 %933  ;;  %v1125_v45 = vld [vmem:[%s2751_s4 + $0x30] sm:$0xff] }
 0x1d0   :  { %v966_v56 = vadd.f32 %v934_v55, %v480_v50  ;;  %v403_v57 = vpop.xlane.xlu0 %402 }
 0x1d1   :  { %v1754_v53 = vpop.eup %1753  ;;  %v1029_v61 = vsub.f32 %v997_v52, %v1013_v46 }
 0x1d2   :  { %v998_v60 = vmul.f32 0.010204081, %v966_v56  ;;  %v1107_v2 = vmul.f32 %v1754_v53, %v1091_v54 }
 0x1d3   :  { %v1045_v4 = vmax.f32 %v1029_v61, 0.0  ;;  %v406_v5 = vpop.xlane.xlu1 %405 }
 0x1d4   :  { %v1756_v58 = vpop.eup %1755  ;;  %v1030_v7 = vsub.f32 %v998_v60, %v1014_v0  ;;  %1205 = vperm.xlu1 %1704, %v1107_v2   ;;  %v857_v62 = vpop.xlane.xlu0 %856  ;;  %v1139_v14 = vmul.f32 %v1107_v2, %v2386_v15 }
 0x1d5   :  { %v1061_v8 = vadd.f32 0.001, %v1045_v4  ;;  %v1108_v10 = vmul.f32 %v1756_v58, %v1092_v3  ;;  %v887_v59 = vadd.f32 %v857_v62, %v403_v57  ;;  %v1095_v3 = vld [vmem:[%s2750_s3 + $0x40] sm:$0xff] }
 0x1d6   :  { %v1046_v12 = vmax.f32 %v1030_v7, 0.0  ;;  %v1155_v9 = vsub.f32 %v1123_v16, %v1139_v14 }
 0x1d7   :  { %1757 = vrsqrt.f32 %v1061_v8  ;;  %v860_v63 = vpop.xlane.xlu1 %859  ;;  %v1140_v18 = vmul.f32 %v1108_v10, %v2388_v1  ;;  %v2430_v23 = vmul.f32 0.010204081, %v887_v59  ;;  %v1127_v59 = vld [vmem:[%s2751_s4 + $0x40] sm:$0xff] }
 0x1d8   :  { %v1062_v19 = vadd.f32 0.001, %v1046_v12  ;;  %1210 = vperm.xlu1 %1704, %v1108_v10   ;;  %v483_v20 = vpop.xlane.xlu0 %482  ;;  %v888_v6 = vadd.f32 %v860_v63, %v406_v5  ;;  %v1096_v12 = vld [vmem:[%s2750_s3 + $0x48] sm:$0xff] }
 0x1d9   :  { %v1156_v21 = vsub.f32 %v1124_v13, %v1140_v18  ;;  %v1015_v1 = vmul.f32 %v2430_v23, %v2430_v23 }
 0x1da   :  { %1759 = vrsqrt.f32 %v1062_v19  ;;  %v2432_v28 = vmul.f32 0.010204081, %v888_v6 }
 0x1db   :  { %v486_v25 = vpop.xlane.xlu1 %485  ;;  %1306 = vperm.xlu0 %1703, %v1156_v21  }
 0x1dc   :  { %1301 = vperm.xlu1 %1704, %v1155_v9   ;;  %v937_v15 = vpop.xlane.xlu0 %936  ;;  %v1016_v36 = vmul.f32 %v2432_v28, %v2432_v28 }
 0x1dd   :  { %v967_v27 = vadd.f32 %v937_v15, %v483_v20 }
 0x1df   :  { %v999_v11 = vmul.f32 0.010204081, %v967_v27  ;;  %v940_v29 = vpop.xlane.xlu1 %939 }
 0x1e0   :  { %v968_v31 = vadd.f32 %v940_v29, %v486_v25  ;;  %v409_v32 = vpop.xlane.xlu0 %408  ;;  %v1128_v25 = vld [vmem:[%s2751_s4 + $0x48] sm:$0xff] }
 0x1e1   :  { %v1758_v34 = vpop.eup %1757  ;;  %v1031_v35 = vsub.f32 %v999_v11, %v1015_v1 }
 0x1e2   :  { %v1000_v37 = vmul.f32 0.010204081, %v968_v31  ;;  %v1109_v17 = vmul.f32 %v1758_v34, %v1093_v30 }
 0x1e3   :  { %v1047_v24 = vmax.f32 %v1031_v35, 0.0  ;;  %v412_v22 = vpop.xlane.xlu1 %411 }
 0x1e4   :  { %v1760_v40 = vpop.eup %1759  ;;  %v1032_v41 = vsub.f32 %v1000_v37, %v1016_v36  ;;  %1215 = vperm.xlu1 %1704, %v1109_v17   ;;  %v863_v42 = vpop.xlane.xlu0 %862  ;;  %v1141_v49 = vmul.f32 %v1109_v17, %v2408_v39 }
 0x1e5   :  { %v1063_v44 = vadd.f32 0.001, %v1047_v24  ;;  %v1110_v47 = vmul.f32 %v1760_v40, %v1094_v38  ;;  %v889_v43 = vadd.f32 %v863_v42, %v409_v32 }
 0x1e6   :  { %v1048_v48 = vmax.f32 %v1032_v41, 0.0  ;;  %v1157_v56 = vsub.f32 %v1125_v45, %v1141_v49 }
 0x1e7   :  { %1761 = vrsqrt.f32 %v1063_v44  ;;  %v866_v50 = vpop.xlane.xlu1 %865  ;;  %v1142_v26 = vmul.f32 %v1110_v47, %v2410_v51  ;;  %v2452_v57 = vmul.f32 0.010204081, %v889_v43  ;;  %v1129_v43 = vld [vmem:[%s2751_s4 + $0x50] sm:$0xff] }
 0x1e8   :  { %v1064_v46 = vadd.f32 0.001, %v1048_v48  ;;  %1220 = vperm.xlu1 %1704, %v1110_v47   ;;  %v489_v52 = vpop.xlane.xlu0 %488  ;;  %v890_v54 = vadd.f32 %v866_v50, %v412_v22  ;;  %v1098_v48 = vld [vmem:[%s2750_s3 + $0x58] sm:$0xff] }
 0x1e9   :  { %v1158_v55 = vsub.f32 %v1126_v33, %v1142_v26  ;;  %v1017_v51 = vmul.f32 %v2452_v57, %v2452_v57 }
 0x1ea   :  { %1763 = vrsqrt.f32 %v1064_v46  ;;  %v2454_v0 = vmul.f32 0.010204081, %v890_v54 }
 0x1eb   :  { %v492_v53 = vpop.xlane.xlu1 %491  ;;  %1316 = vperm.xlu0 %1703, %v1158_v55  }
 0x1ec   :  { %1311 = vperm.xlu1 %1704, %v1157_v56   ;;  %v943_v39 = vpop.xlane.xlu0 %942  ;;  %v1018_v62 = vmul.f32 %v2454_v0, %v2454_v0 }
 0x1ed   :  { %v969_v61 = vadd.f32 %v943_v39, %v489_v52 }
 0x1ef   :  { %v1001_v60 = vmul.f32 0.010204081, %v969_v61  ;;  %v946_v2 = vpop.xlane.xlu1 %945 }
 0x1f0   :  { %v970_v4 = vadd.f32 %v946_v2, %v492_v53  ;;  %v415_v5 = vpop.xlane.xlu0 %414  ;;  %v1130_v53 = vld [vmem:[%s2751_s4 + $0x58] sm:$0xff] }
 0x1f1   :  { %v1762_v58 = vpop.eup %1761  ;;  %v1033_v7 = vsub.f32 %v1001_v60, %v1017_v51 }
 0x1f2   :  { %v1002_v8 = vmul.f32 0.010204081, %v970_v4  ;;  %v1111_v10 = vmul.f32 %v1762_v58, %v1095_v3 }
 0x1f3   :  { %v1049_v13 = vmax.f32 %v1033_v7, 0.0  ;;  %v418_v14 = vpop.xlane.xlu1 %417 }
 0x1f4   :  { %v1764_v63 = vpop.eup %1763  ;;  %v1034_v18 = vsub.f32 %v1002_v8, %v1018_v62  ;;  %1225 = vperm.xlu1 %1704, %v1111_v10   ;;  %v869_v16 = vpop.xlane.xlu0 %868  ;;  %v1143_v19 = vmul.f32 %v1111_v10, %v2430_v23 }
 0x1f5   :  { %v1065_v20 = vadd.f32 0.001, %v1049_v13  ;;  %v1112_v21 = vmul.f32 %v1764_v63, %v1096_v12  ;;  %v891_v15 = vadd.f32 %v869_v16, %v415_v5  ;;  %v1099_v13 = vld [vmem:[%s2750_s3 + $0x60] sm:$0xff] }
 0x1f6   :  { %v1050_v6 = vmax.f32 %v1034_v18, 0.0  ;;  %v1159_v9 = vsub.f32 %v1127_v59, %v1143_v19  ;;  %v1100_v19 = vld [vmem:[%s2750_s3 + $0x68] sm:$0xff] }
 0x1f7   :  { %1765 = vrsqrt.f32 %v1065_v20  ;;  %v872_v27 = vpop.xlane.xlu1 %871  ;;  %1230 = vperm.xlu0 %1703, %v1112_v21   ;;  %v1144_v1 = vmul.f32 %v1112_v21, %v2432_v28  ;;  %v2474_v31 = vmul.f32 0.010204081, %v891_v15  ;;  %v1097_v28 = vld [vmem:[%s2750_s3 + $0x50] sm:$0xff]  ;;  %v1131_v21 = vld [vmem:[%s2751_s4 + $0x60] sm:$0xff] }
 0x1f8   :  { %v1066_v11 = vadd.f32 0.001, %v1050_v6  ;;  %1321 = vperm.xlu1 %1704, %v1159_v9   ;;  %v495_v29 = vpop.xlane.xlu0 %494  ;;  %v892_v23 = vadd.f32 %v872_v27, %v418_v14 }
 0x1f9   :  { %v1160_v30 = vsub.f32 %v1128_v25, %v1144_v1  ;;  %v1019_v37 = vmul.f32 %v2474_v31, %v2474_v31 }
 0x1fa   :  { %1767 = vrsqrt.f32 %v1066_v11  ;;  %v2476_v36 = vmul.f32 0.010204081, %v892_v23 }
 0x1fb   :  { %v498_v32 = vpop.xlane.xlu1 %497  ;;  %1326 = vperm.xlu0 %1703, %v1160_v30  }
 0x1fc   :  { %v949_v34 = vpop.xlane.xlu0 %948  ;;  %v1020_v42 = vmul.f32 %v2476_v36, %v2476_v36 }
 0x1fd   :  { %v971_v35 = vadd.f32 %v949_v34, %v495_v29  ;;  %v1132_v29 = vld [vmem:[%s2751_s4 + $0x68] sm:$0xff] }
 0x1ff   :  { %v1003_v17 = vmul.f32 0.010204081, %v971_v35  ;;  %v952_v38 = vpop.xlane.xlu1 %951 }
 0x200   :  { %v972_v24 = vadd.f32 %v952_v38, %v498_v32  ;;  %v421_v22 = vpop.xlane.xlu0 %420 }
 0x201   :  { %v1766_v40 = vpop.eup %1765  ;;  %v1035_v41 = vsub.f32 %v1003_v17, %v1019_v37  ;;  %v1102_v37 = vld [vmem:[%s2750_s3 + $0x78] sm:$0xff]  ;;  %v1133_v17 = vld [vmem:[%s2751_s4 + $0x70] sm:$0xff] }
 0x202   :  { %v1004_v44 = vmul.f32 0.010204081, %v972_v24  ;;  %v1113_v47 = vmul.f32 %v1766_v40, %v1097_v28 }
 0x203   :  { %v1051_v33 = vmax.f32 %v1035_v41, 0.0  ;;  %v424_v49 = vpop.xlane.xlu1 %423 }
 0x204   :  { %v1768_v50 = vpop.eup %1767  ;;  %v1036_v26 = vsub.f32 %v1004_v44, %v1020_v42  ;;  %1235 = vperm.xlu1 %1704, %v1113_v47   ;;  %v875_v45 = vpop.xlane.xlu0 %874  ;;  %v1145_v46 = vmul.f32 %v1113_v47, %v2452_v57  ;;  %v1167_v47 = vld [vmem:[%s2749_s5] sm:$0xff] }
 0x205   :  { %v1067_v52 = vadd.f32 0.001, %v1051_v33  ;;  %v1114_v55 = vmul.f32 %v1768_v50, %v1098_v48  ;;  %v893_v39 = vadd.f32 %v875_v45, %v421_v22  ;;  %v1134_v22 = vld [vmem:[%s2751_s4 + $0x78] sm:$0xff]  ;;  %v1168_v48 = vld [vmem:[%s2749_s5 + $0x8] sm:$0xff] }
 0x206   :  { %v1052_v54 = vmax.f32 %v1036_v26, 0.0  ;;  %v1161_v56 = vsub.f32 %v1129_v43, %v1145_v46  ;;  %v1543_v33 = vld [vmem:[%s2749_s5 + $0x88] sm:$0xff] }
 0x207   :  { %1769 = vrsqrt.f32 %v1067_v52  ;;  %v878_v61 = vpop.xlane.xlu1 %877  ;;  %1240 = vperm.xlu0 %1703, %v1114_v55   ;;  %v1146_v51 = vmul.f32 %v1114_v55, %v2454_v0  ;;  %v989_v4 = vmul.f32 0.010204081, %v893_v39 }
 0x208   :  { %v1068_v60 = vadd.f32 0.001, %v1052_v54  ;;  %1331 = vperm.xlu1 %1704, %v1161_v56   ;;  %v501_v2 = vpop.xlane.xlu0 %500  ;;  %v894_v57 = vadd.f32 %v878_v61, %v424_v49  ;;  %v1542_v49 = vld [vmem:[%s2749_s5 + $0x80] sm:$0xff]  ;;  %v1170_v61 = vld [vmem:[%s2749_s5 + $0x18] sm:$0xff] }
 0x209   :  { %v1162_v3 = vsub.f32 %v1130_v53, %v1146_v51  ;;  %v1021_v8 = vmul.f32 %v989_v4, %v989_v4  ;;  %v1545_v51 = vld [vmem:[%s2749_s5 + $0x98] sm:$0xff] }
 0x20a   :  { %1771 = vrsqrt.f32 %v1068_v60  ;;  %v990_v62 = vmul.f32 0.010204081, %v894_v57  ;;  %v1169_v57 = vld [vmem:[%s2749_s5 + $0x10] sm:$0xff] }
 0x20b   :  { %v504_v5 = vpop.xlane.xlu1 %503  ;;  %1336 = vperm.xlu0 %1703, %v1162_v3  }
 0x20c   :  { %v955_v58 = vpop.xlane.xlu0 %954  ;;  %v1022_v63 = vmul.f32 %v990_v62, %v990_v62 }
 0x20d   :  { %v973_v7 = vadd.f32 %v955_v58, %v501_v2 }
 0x20f   :  { %v1005_v10 = vmul.f32 0.010204081, %v973_v7  ;;  %v958_v12 = vpop.xlane.xlu1 %957 }
 0x210   :  { %v974_v0 = vadd.f32 %v958_v12, %v504_v5 }
 0x211   :  { %v1770_v14 = vpop.eup %1769  ;;  %v1037_v59 = vsub.f32 %v1005_v10, %v1021_v8 }
 0x212   :  { %v1006_v18 = vmul.f32 0.010204081, %v974_v0  ;;  %v1115_v16 = vmul.f32 %v1770_v14, %v1099_v13  ;;  %v1172_v14 = vld [vmem:[%s2749_s5 + $0x28] sm:$0xff] }
 0x213   :  { %v1053_v20 = vmax.f32 %v1037_v59, 0.0  ;;  %v1547_v59 = vld [vmem:[%s2749_s5 + $0xa8] sm:$0xff] }
 0x214   :  { %v1772_v6 = vpop.eup %1771  ;;  %v1038_v9 = vsub.f32 %v1006_v18, %v1022_v63  ;;  %1245 = vperm.xlu1 %1704, %v1115_v16   ;;  %v1147_v25 = vmul.f32 %v1115_v16, %v2474_v31  ;;  %v1101_v31 = vld [vmem:[%s2750_s3 + $0x70] sm:$0xff] }
 0x215   :  { %v1069_v15 = vadd.f32 0.001, %v1053_v20  ;;  %v1116_v27 = vmul.f32 %v1772_v6, %v1100_v19  ;;  %v1171_v19 = vld [vmem:[%s2749_s5 + $0x20] sm:$0xff] }
 0x216   :  { %v1054_v1 = vmax.f32 %v1038_v9, 0.0  ;;  %v1163_v11 = vsub.f32 %v1131_v21, %v1147_v25  ;;  %v1546_v20 = vld [vmem:[%s2749_s5 + $0xa0] sm:$0xff] }
 0x217   :  { %1773 = vrsqrt.f32 %v1069_v15  ;;  %1250 = vperm.xlu0 %1703, %v1116_v27   ;;  %v1148_v30 = vmul.f32 %v1116_v27, %v2476_v36 }
 0x218   :  { %v1070_v23 = vadd.f32 0.001, %v1054_v1  ;;  %1341 = vperm.xlu1 %1704, %v1163_v11  }
 0x219   :  { %v1164_v32 = vsub.f32 %v1132_v29, %v1148_v30  ;;  %v1174_v30 = vld [vmem:[%s2749_s5 + $0x38] sm:$0xff] }
 0x21a   :  { %1775 = vrsqrt.f32 %v1070_v23  ;;  %v1549_v23 = vld [vmem:[%s2749_s5 + $0xb8] sm:$0xff] }
 0x21b   :  { %1346 = vperm.xlu0 %1703, %v1164_v32  }
 0x221   :  { %v1774_v34 = vpop.eup %1773 }
 0x222   :  { %v1117_v35 = vmul.f32 %v1774_v34, %v1101_v31 }
 0x224   :  { %v1776_v36 = vpop.eup %1775  ;;  %1255 = vperm.xlu1 %1704, %v1117_v35   ;;  %v1149_v38 = vmul.f32 %v1117_v35, %v989_v4  ;;  %v1544_v4 = vld [vmem:[%s2749_s5 + $0x90] sm:$0xff] }
 0x225   :  { %v1118_v28 = vmul.f32 %v1776_v36, %v1102_v37  ;;  %v1173_v35 = vld [vmem:[%s2749_s5 + $0x30] sm:$0xff] }
 0x226   :  { %v1165_v24 = vsub.f32 %v1133_v17, %v1149_v38  ;;  %v1548_v37 = vld [vmem:[%s2749_s5 + $0xb0] sm:$0xff] }
 0x227   :  { %1260 = vperm.xlu0 %1703, %v1118_v28   ;;  %v1150_v40 = vmul.f32 %v1118_v28, %v990_v62 }
 0x228   :  { %1351 = vperm.xlu1 %1704, %v1165_v24  }
 0x229   :  { %v1166_v41 = vsub.f32 %v1134_v22, %v1150_v40 }
 0x22b   :  { %1356 = vperm.xlu0 %1703, %v1166_v41  }
 0x232   :  { %v1191_v42 = vpop.permute.xlu1 %1190 }
 0x233   :  { %v1264_v43 = vmul.f32 %v1191_v42, %v1168_v48  ;;  %v1408_v50 = vmul.f32 %v1543_v33, %v1191_v42 }
 0x237   :  { %v1186_v44 = vpop.permute.xlu0 %1185 }
 0x238   :  { %v1263_v26 = vmul.f32 %v1186_v44, %v1167_v47  ;;  %v1407_v45 = vmul.f32 %v1542_v49, %v1186_v44  ;;  %v1175_v44 = vld [vmem:[%s2749_s5 + $0x40] sm:$0xff] }
 0x239   :  { %v1550_v47 = vld [vmem:[%s2749_s5 + $0xc0] sm:$0xff] }
 0x23b   :  { %v1282_v46 = vpop.permute.xlu1 %1281  ;;  %v1287_v52 = vpop.permute.xlu0 %1286 }
 0x23c   :  { %v1359_v55 = vadd.f32 %v1282_v46, %v1263_v26  ;;  %v1423_v54 = vadd.f32 %v1407_v45, %v1282_v46  ;;  %v1360_v56 = vadd.f32 %v1287_v52, %v1264_v43  ;;  %v1424_v53 = vadd.f32 %v1408_v50, %v1287_v52  ;;  %v1176_v50 = vld [vmem:[%s2749_s5 + $0x48] sm:$0xff] }
 0x23d   :  { %v1551_v26 = vld [vmem:[%s2749_s5 + $0xc8] sm:$0xff] }
 0x23e   :  { %1375 = vst.msk [vmem:[%s2749_s5] sm:$0xff] %vm360_vm0, %v1359_v55  ;;  %1558 = vst.msk [vmem:[%s2749_s5 + $0x80] sm:$0xff] %vm360_vm0, %v1423_v54 }
 0x23f   :  { %1376 = vst.msk [vmem:[%s2749_s5 + $0x8] sm:$0xff] %vm360_vm0, %v1360_v56  ;;  %1559 = vst.msk [vmem:[%s2749_s5 + $0x88] sm:$0xff] %vm360_vm0, %v1424_v53 }
 0x243   :  { %v1196_v39 = vpop.permute.xlu1 %1195 }
 0x244   :  { %v1265_v5 = vmul.f32 %v1196_v39, %v1169_v57  ;;  %v1409_v58 = vmul.f32 %v1544_v4, %v1196_v39  ;;  %v1178_v4 = vld [vmem:[%s2749_s5 + $0x58] sm:$0xff] }
 0x247   :  { %v1201_v60 = vpop.permute.xlu1 %1200 }
 0x248   :  { %v1266_v2 = vmul.f32 %v1201_v60, %v1170_v61  ;;  %v1410_v3 = vmul.f32 %v1545_v51, %v1201_v60  ;;  %v1177_v61 = vld [vmem:[%s2749_s5 + $0x50] sm:$0xff] }
 0x249   :  { %v1552_v51 = vld [vmem:[%s2749_s5 + $0xd0] sm:$0xff] }
 0x24a   :  { %v1297_v7 = vpop.permute.xlu0 %1296 }
 0x24b   :  { %v1362_v62 = vadd.f32 %v1297_v7, %v1266_v2  ;;  %v1426_v8 = vadd.f32 %v1410_v3, %v1297_v7  ;;  %v1292_v10 = vpop.permute.xlu1 %1291 }
 0x24c   :  { %v1361_v12 = vadd.f32 %v1292_v10, %v1265_v5  ;;  %v1425_v13 = vadd.f32 %v1409_v58, %v1292_v10  ;;  %v1553_v5 = vld [vmem:[%s2749_s5 + $0xd8] sm:$0xff] }
 0x24d   :  { %1378 = vst.msk [vmem:[%s2749_s5 + $0x18] sm:$0xff] %vm360_vm0, %v1362_v62  ;;  %1561 = vst.msk [vmem:[%s2749_s5 + $0x98] sm:$0xff] %vm360_vm0, %v1426_v8 }
 0x24e   :  { %1377 = vst.msk [vmem:[%s2749_s5 + $0x10] sm:$0xff] %vm360_vm0, %v1361_v12  ;;  %1560 = vst.msk [vmem:[%s2749_s5 + $0x90] sm:$0xff] %vm360_vm0, %v1425_v13 }
 0x253   :  { %v1206_v0 = vpop.permute.xlu1 %1205 }
 0x254   :  { %v1267_v21 = vmul.f32 %v1206_v0, %v1171_v19  ;;  %v1411_v6 = vmul.f32 %v1546_v20, %v1206_v0  ;;  %v1180_v20 = vld [vmem:[%s2749_s5 + $0x68] sm:$0xff] }
 0x257   :  { %v1211_v63 = vpop.permute.xlu1 %1210 }
 0x258   :  { %v1268_v18 = vmul.f32 %v1211_v63, %v1172_v14  ;;  %v1412_v16 = vmul.f32 %v1547_v59, %v1211_v63  ;;  %v1179_v14 = vld [vmem:[%s2749_s5 + $0x60] sm:$0xff] }
 0x259   :  { %v1554_v59 = vld [vmem:[%s2749_s5 + $0xe0] sm:$0xff] }
 0x25a   :  { %v1307_v9 = vpop.permute.xlu0 %1306 }
 0x25b   :  { %v1364_v25 = vadd.f32 %v1307_v9, %v1268_v18  ;;  %v1428_v15 = vadd.f32 %v1412_v16, %v1307_v9  ;;  %v1302_v27 = vpop.permute.xlu1 %1301 }
 0x25c   :  { %v1363_v1 = vadd.f32 %v1302_v27, %v1267_v21  ;;  %v1427_v11 = vadd.f32 %v1411_v6, %v1302_v27  ;;  %v1555_v21 = vld [vmem:[%s2749_s5 + $0xe8] sm:$0xff] }
 0x25d   :  { %1380 = vst.msk [vmem:[%s2749_s5 + $0x28] sm:$0xff] %vm360_vm0, %v1364_v25  ;;  %1563 = vst.msk [vmem:[%s2749_s5 + $0xa8] sm:$0xff] %vm360_vm0, %v1428_v15 }
 0x25e   :  { %1379 = vst.msk [vmem:[%s2749_s5 + $0x20] sm:$0xff] %vm360_vm0, %v1363_v1  ;;  %1562 = vst.msk [vmem:[%s2749_s5 + $0xa0] sm:$0xff] %vm360_vm0, %v1427_v11 }
 0x263   :  { %v1216_v29 = vpop.permute.xlu1 %1215 }
 0x264   :  { %v1269_v17 = vmul.f32 %v1216_v29, %v1173_v35  ;;  %v1413_v36 = vmul.f32 %v1548_v37, %v1216_v29  ;;  %v1182_v37 = vld [vmem:[%s2749_s5 + $0x78] sm:$0xff] }
 0x267   :  { %v1221_v32 = vpop.permute.xlu1 %1220 }
 0x268   :  { %v1270_v31 = vmul.f32 %v1221_v32, %v1174_v30  ;;  %v1414_v34 = vmul.f32 %v1549_v23, %v1221_v32  ;;  %v1181_v30 = vld [vmem:[%s2749_s5 + $0x70] sm:$0xff] }
 0x269   :  { %v1556_v23 = vld [vmem:[%s2749_s5 + $0xf0] sm:$0xff] }
 0x26a   :  { %v1317_v38 = vpop.permute.xlu0 %1316 }
 0x26b   :  { %v1366_v28 = vadd.f32 %v1317_v38, %v1270_v31  ;;  %v1430_v24 = vadd.f32 %v1414_v34, %v1317_v38  ;;  %v1312_v22 = vpop.permute.xlu1 %1311 }
 0x26c   :  { %v1365_v40 = vadd.f32 %v1312_v22, %v1269_v17  ;;  %v1429_v41 = vadd.f32 %v1413_v36, %v1312_v22  ;;  %v1557_v17 = vld [vmem:[%s2749_s5 + $0xf8] sm:$0xff] }
 0x26d   :  { %1382 = vst.msk [vmem:[%s2749_s5 + $0x38] sm:$0xff] %vm360_vm0, %v1366_v28  ;;  %1565 = vst.msk [vmem:[%s2749_s5 + $0xb8] sm:$0xff] %vm360_vm0, %v1430_v24 }
 0x26e   :  { %1381 = vst.msk [vmem:[%s2749_s5 + $0x30] sm:$0xff] %vm360_vm0, %v1365_v40  ;;  %1564 = vst.msk [vmem:[%s2749_s5 + $0xb0] sm:$0xff] %vm360_vm0, %v1429_v41 }
 0x273   :  { %v1226_v42 = vpop.permute.xlu1 %1225 }
 0x274   :  { %v1271_v48 = vmul.f32 %v1226_v42, %v1175_v44  ;;  %v1415_v33 = vmul.f32 %v1550_v47, %v1226_v42 }
 0x276   :  { %v1231_v49 = vpop.permute.xlu0 %1230 }
 0x277   :  { %v1322_v43 = vpop.permute.xlu1 %1321  ;;  %v1272_v52 = vmul.f32 %v1231_v49, %v1176_v50  ;;  %v1416_v55 = vmul.f32 %v1551_v26, %v1231_v49 }
 0x278   :  { %v1367_v45 = vadd.f32 %v1322_v43, %v1271_v48  ;;  %v1431_v46 = vadd.f32 %v1415_v33, %v1322_v43 }
 0x27a   :  { %1383 = vst.msk [vmem:[%s2749_s5 + $0x40] sm:$0xff] %vm360_vm0, %v1367_v45  ;;  %1566 = vst.msk [vmem:[%s2749_s5 + $0xc0] sm:$0xff] %vm360_vm0, %v1431_v46  ;;  %v1327_v54 = vpop.permute.xlu0 %1326 }
 0x27b   :  { %v1368_v56 = vadd.f32 %v1327_v54, %v1272_v52  ;;  %v1432_v53 = vadd.f32 %v1416_v55, %v1327_v54 }
 0x27d   :  { %1384 = vst.msk [vmem:[%s2749_s5 + $0x48] sm:$0xff] %vm360_vm0, %v1368_v56  ;;  %1567 = vst.msk [vmem:[%s2749_s5 + $0xc8] sm:$0xff] %vm360_vm0, %v1432_v53 }
 0x283   :  { %v1236_v39 = vpop.permute.xlu1 %1235 }
 0x284   :  { %v1273_v60 = vmul.f32 %v1236_v39, %v1177_v61  ;;  %v1417_v2 = vmul.f32 %v1552_v51, %v1236_v39 }
 0x286   :  { %v1241_v3 = vpop.permute.xlu0 %1240 }
 0x287   :  { %v1332_v57 = vpop.permute.xlu1 %1331  ;;  %v1274_v62 = vmul.f32 %v1241_v3, %v1178_v4  ;;  %v1418_v8 = vmul.f32 %v1553_v5, %v1241_v3 }
 0x288   :  { %v1369_v58 = vadd.f32 %v1332_v57, %v1273_v60  ;;  %v1433_v7 = vadd.f32 %v1417_v2, %v1332_v57 }
 0x28a   :  { %1385 = vst.msk [vmem:[%s2749_s5 + $0x50] sm:$0xff] %vm360_vm0, %v1369_v58  ;;  %1568 = vst.msk [vmem:[%s2749_s5 + $0xd0] sm:$0xff] %vm360_vm0, %v1433_v7  ;;  %v1337_v10 = vpop.permute.xlu0 %1336 }
 0x28b   :  { %v1370_v12 = vadd.f32 %v1337_v10, %v1274_v62  ;;  %v1434_v13 = vadd.f32 %v1418_v8, %v1337_v10 }
 0x28d   :  { %1386 = vst.msk [vmem:[%s2749_s5 + $0x58] sm:$0xff] %vm360_vm0, %v1370_v12  ;;  %1569 = vst.msk [vmem:[%s2749_s5 + $0xd8] sm:$0xff] %vm360_vm0, %v1434_v13 }
 0x293   :  { %v1246_v0 = vpop.permute.xlu1 %1245 }
 0x294   :  { %v1275_v63 = vmul.f32 %v1246_v0, %v1179_v14  ;;  %v1419_v18 = vmul.f32 %v1554_v59, %v1246_v0 }
 0x296   :  { %v1251_v16 = vpop.permute.xlu0 %1250 }
 0x297   :  { %v1342_v19 = vpop.permute.xlu1 %1341  ;;  %v1276_v25 = vmul.f32 %v1251_v16, %v1180_v20  ;;  %v1420_v15 = vmul.f32 %v1555_v21, %v1251_v16 }
 0x298   :  { %v1371_v6 = vadd.f32 %v1342_v19, %v1275_v63  ;;  %v1435_v9 = vadd.f32 %v1419_v18, %v1342_v19 }
 0x29a   :  { %1387 = vst.msk [vmem:[%s2749_s5 + $0x60] sm:$0xff] %vm360_vm0, %v1371_v6  ;;  %1570 = vst.msk [vmem:[%s2749_s5 + $0xe0] sm:$0xff] %vm360_vm0, %v1435_v9  ;;  %v1347_v27 = vpop.permute.xlu0 %1346 }
 0x29b   :  { %v1372_v1 = vadd.f32 %v1347_v27, %v1276_v25  ;;  %v1436_v11 = vadd.f32 %v1420_v15, %v1347_v27 }
 0x29d   :  { %1388 = vst.msk [vmem:[%s2749_s5 + $0x68] sm:$0xff] %vm360_vm0, %v1372_v1  ;;  %1571 = vst.msk [vmem:[%s2749_s5 + $0xe8] sm:$0xff] %vm360_vm0, %v1436_v11 }
 0x2a3   :  { %v1256_v29 = vpop.permute.xlu1 %1255 }
 0x2a4   :  { %v1277_v32 = vmul.f32 %v1256_v29, %v1181_v30  ;;  %v1421_v31 = vmul.f32 %v1556_v23, %v1256_v29 }
 0x2a6   :  { %v1261_v34 = vpop.permute.xlu0 %1260 }
 0x2a7   :  { %v1352_v35 = vpop.permute.xlu1 %1351  ;;  %v1278_v28 = vmul.f32 %v1261_v34, %v1182_v37  ;;  %v1422_v24 = vmul.f32 %v1557_v17, %v1261_v34 }
 0x2a8   :  { %v1373_v36 = vadd.f32 %v1352_v35, %v1277_v32  ;;  %v1437_v38 = vadd.f32 %v1421_v31, %v1352_v35 }
 0x2aa   :  { %1389 = vst.msk [vmem:[%s2749_s5 + $0x70] sm:$0xff] %vm360_vm0, %v1373_v36  ;;  %1572 = vst.msk [vmem:[%s2749_s5 + $0xf0] sm:$0xff] %vm360_vm0, %v1437_v38  ;;  %v1357_v22 = vpop.permute.xlu0 %1356 }
 0x2ab   :  { %v1374_v40 = vadd.f32 %v1357_v22, %v1278_v28  ;;  %v1438_v41 = vadd.f32 %v1422_v24, %v1357_v22 }
 0x2ad   :  { %1390 = vst.msk [vmem:[%s2749_s5 + $0x78] sm:$0xff] %vm360_vm0, %v1374_v40  ;;  %1573 = vst.msk [vmem:[%s2749_s5 + $0xf8] sm:$0xff] %vm360_vm0, %v1438_v41 }

</bundles_post_ra>
